<compile_context>
chip_gen: v6e
topology: v6e:2x2x1
jax: 0.10.0
libtpu: 0.0.40
codegen_flags: <defaults>
</compile_context>

<pallas_src>
import math

import jax
import jax.numpy as jnp
from jax import lax
from jax.experimental import pallas as pl
from jax.experimental.pallas import tpu as pltpu

# ---------------- model constants ----------------
MAX_DURATION = 30
SOS_DURATION = MAX_DURATION + 1          # 31
VOCAB = MAX_DURATION + 3                 # 33  (project_out_dim output width)
NUM_TOK_EMB = VOCAB + 3                  # 36  (nn.Embedding(vocab_size + 3, H))
HIDDEN = 32
NUM_HEADS = 2
HEAD_DIM = HIDDEN // NUM_HEADS
FFN = 4 * HIDDEN                         # 128
EPS = 1e-5
NEG = -1e9                               # finite stand-in for -inf masks
LANES = 128                              # lane-padded slab / output width
W_ROWS = 3 * HIDDEN + FFN                # 224 rows per-layer weight slab
B_ROWS = 64                              # 8 bias rows, spaced 8 apart (aligned)


# ---------------- fused Pallas kernel ----------------
def _ln(x, g, b):
    mu = jnp.mean(x, axis=-1, keepdims=True)
    var = jnp.mean((x - mu) ** 2, axis=-1, keepdims=True)
    return (x - mu) * lax.rsqrt(var + EPS) * g + b


def fused_decoder_kernel(x_ref, keep_ref, kbias_ref, cond_ref,
                         wslab_ref, bslab_ref, fw_ref, fb_ref, o_ref):
    """Whole decoder stack for the whole batch in one grid step.

    x_ref     : (B*T, H)      flattened activations (enc_out + pos + tok emb)
    keep_ref  : (B*T, H)      1.0 at non-padded positions (broadcast over H)
    kbias_ref : (B, 1, T)     additive key-padding bias (NEG at padded keys)
    cond_ref  : (B*T, H)      condition vector, pre-broadcast per position
    wslab_ref : (L, 224, 128) per-layer weight slab  [wqkv | wo | w1 | w2]
    bslab_ref : (L, 64, 128)  per-layer bias slab, one bias every 8 rows
    fw_ref    : (96, 128)     [w_scale | w_bias | w_proj(pad->128)]
    fb_ref    : (24, 128)     rows 0/8/16 = b_scale / b_bias / b_proj(pad)
    o_ref     : (B*T, 128)    lane-dense logits (sliced to VOCAB outside)
    """
    BT, H = x_ref.shape
    B = kbias_ref.shape[0]
    T = kbias_ref.shape[2]
    L = wslab_ref.shape[0]
    H3 = 3 * H
    F = FFN

    x = x_ref[...]                        # (BT, H)
    keep = keep_ref[...]                  # (BT, H)

    # causal mask built in-kernel (no O(T^2) HBM input)
    r_i = lax.broadcasted_iota(jnp.int32, (T, T), 0)
    c_i = lax.broadcasted_iota(jnp.int32, (T, T), 1)
    causal = jnp.where(c_i > r_i, jnp.float32(NEG), jnp.float32(0.0))

    qscale = 1.0 / math.sqrt(HEAD_DIM)

    for l in range(L):                    # static loop over layers
        W = wslab_ref[l]                  # (224, 128)
        Bv = bslab_ref[l]                 # (64, 128)
        wqkv = W[0:H, 0:H3]               # (H, 3H)
        wo = W[H:2 * H, 0:H]              # (H, H)
        w1 = W[2 * H:3 * H, 0:F]          # (H, F)
        w2 = W[3 * H:3 * H + F, 0:H]      # (F, H)
        ln1_g = Bv[0:1, 0:H]
        ln1_b = Bv[8:9, 0:H]
        bqkv = Bv[16:17, 0:H3]
        bo = Bv[24:25, 0:H]
        ln2_g = Bv[32:33, 0:H]
        ln2_b = Bv[40:41, 0:H]
        b1 = Bv[48:49, 0:F]
        b2 = Bv[56:57, 0:H]

        # ---- self-attention (pre-LN), fused QKV over the whole batch ----
        residual = x
        y = _ln(x, ln1_g, ln1_b)
        qkv = jnp.dot(y, wqkv, preferred_element_type=jnp.float32) + bqkv  # (BT, 3H)

        per_batch = []
        for b in range(B):                # static loop; attention per sequence
            r0 = b * T
            kpad = kbias_ref[b]           # (1, T) key-padding additive bias
            amask = causal + kpad         # (T, T)
            qb = qkv[r0:r0 + T, 0:H] * qscale
            kb = qkv[r0:r0 + T, H:2 * H]
            vb = qkv[r0:r0 + T, 2 * H:H3]
            heads = []
            for h in range(NUM_HEADS):    # static loop over heads
                c0 = h * HEAD_DIM
                s = jnp.dot(qb[:, c0:c0 + HEAD_DIM], kb[:, c0:c0 + HEAD_DIM].T,
                            preferred_element_type=jnp.float32) + amask
                s = s - jnp.max(s, axis=-1, keepdims=True)
                p = jnp.exp(s)
                p = p * pl.reciprocal(jnp.sum(p, axis=-1, keepdims=True),
                                      approx=True)
                heads.append(jnp.dot(p, vb[:, c0:c0 + HEAD_DIM],
                                     preferred_element_type=jnp.float32))
            per_batch.append(jnp.concatenate(heads, axis=1))               # (T, H)
        attn = jnp.concatenate(per_batch, axis=0)                          # (BT, H)
        attn = jnp.dot(attn, wo, preferred_element_type=jnp.float32) + bo
        x = (residual + attn) * keep

        # ---- feed-forward (pre-LN), whole batch ----
        residual = x
        y = _ln(x, ln2_g, ln2_b)
        h1 = jnp.maximum(
            jnp.dot(y, w1, preferred_element_type=jnp.float32) + b1, 0.0)
        h2 = jnp.dot(h1, w2, preferred_element_type=jnp.float32) + b2
        x = (residual + h2) * keep

    # ---- final conditional layer norm + lane-dense output projection ----
    Fw = fw_ref[...]                      # (96, 128)
    Fb = fb_ref[...]                      # (24, 128)
    w_scale = Fw[0:H, 0:H]
    w_bias = Fw[H:2 * H, 0:H]
    w_proj = Fw[2 * H:3 * H, :]           # (H, 128)  lane-padded vocab
    b_scale = Fb[0:1, 0:H]
    b_bias = Fb[8:9, 0:H]
    b_proj = Fb[16:17, :]                 # (1, 128)

    cond = cond_ref[...]                  # (BT, H)
    mu = jnp.mean(x, axis=-1, keepdims=True)
    var = jnp.mean((x - mu) ** 2, axis=-1, keepdims=True)
    xn = (x - mu) * lax.rsqrt(var + EPS)
    cscale = jnp.dot(cond, w_scale, preferred_element_type=jnp.float32) + b_scale
    cbias = jnp.dot(cond, w_bias, preferred_element_type=jnp.float32) + b_bias
    yf = xn * cscale + cbias

    o_ref[...] = jnp.dot(yf, w_proj, preferred_element_type=jnp.float32) + b_proj


# ---------------- pallas_call wrapper ----------------
def _full_spec(shape):
    if len(shape) == 2:
        return pl.BlockSpec(shape, lambda i: (0, 0))
    return pl.BlockSpec(shape, lambda i: (0, 0, 0))


def run_fused_decoder(x_flat, keep, kbias, cond_flat, wslab, bslab, fw, fb):
    BT = x_flat.shape[0]
    args = (x_flat, keep, kbias, cond_flat, wslab, bslab, fw, fb)
    return pl.pallas_call(
        fused_decoder_kernel,
        out_shape=jax.ShapeDtypeStruct((BT, LANES), jnp.float32),
        grid=(1,),
        in_specs=[_full_spec(a.shape) for a in args],
        out_specs=_full_spec((BT, LANES)),
        compiler_params=pltpu.CompilerParams(
            dimension_semantics=("arbitrary",)),
    )(*args)


# ---------------- parameter packing ----------------
def pack_params(params):
    """Pack per-layer weights/biases into lane-padded slabs for the kernel."""
    H, F, H3, V = HIDDEN, FFN, 3 * HIDDEN, VOCAB
    wslabs, bslabs = [], []
    for lp in params["layers"]:
        W = jnp.zeros((W_ROWS, LANES), jnp.float32)
        W = W.at[0:H, 0:H3].set(
            jnp.concatenate([lp["wq"], lp["wk"], lp["wv"]], axis=1))
        W = W.at[H:2 * H, 0:H].set(lp["wo"])
        W = W.at[2 * H:3 * H, 0:F].set(lp["w1"])
        W = W.at[3 * H:3 * H + F, 0:H].set(lp["w2"])

        Bv = jnp.zeros((B_ROWS, LANES), jnp.float32)
        Bv = Bv.at[0, 0:H].set(lp["ln1_g"][0])
        Bv = Bv.at[8, 0:H].set(lp["ln1_b"][0])
        Bv = Bv.at[16, 0:H3].set(
            jnp.concatenate([lp["bq"], lp["bk"], lp["bv"]], axis=1)[0])
        Bv = Bv.at[24, 0:H].set(lp["bo"][0])
        Bv = Bv.at[32, 0:H].set(lp["ln2_g"][0])
        Bv = Bv.at[40, 0:H].set(lp["ln2_b"][0])
        Bv = Bv.at[48, 0:F].set(lp["b1"][0])
        Bv = Bv.at[56, 0:H].set(lp["b2"][0])
        wslabs.append(W)
        bslabs.append(Bv)
    wslab = jnp.stack(wslabs, axis=0)          # (L, 224, 128)
    bslab = jnp.stack(bslabs, axis=0)          # (L, 64, 128)

    fp = params["final"]
    Fw = jnp.zeros((3 * H, LANES), jnp.float32)
    Fw = Fw.at[0:H, 0:H].set(fp["w_scale"])
    Fw = Fw.at[H:2 * H, 0:H].set(fp["w_bias"])
    Fw = Fw.at[2 * H:3 * H, 0:V].set(fp["w_proj"])
    Fb = jnp.zeros((24, LANES), jnp.float32)
    Fb = Fb.at[0, 0:H].set(fp["b_scale"][0])
    Fb = Fb.at[8, 0:H].set(fp["b_bias"][0])
    Fb = Fb.at[16, 0:V].set(fp["b_proj"][0])
    return wslab, bslab, Fw, Fb


# ---------------- glue (plain JAX) ----------------
def sinusoidal_table(num_embeddings, dim, padding_idx=0):
    """fairseq SinusoidalPositionalEmbedding.get_embedding"""
    half = dim // 2
    step = math.log(10000.0) / (half - 1)
    freqs = jnp.exp(jnp.arange(half, dtype=jnp.float32) * -step)
    args = jnp.arange(num_embeddings, dtype=jnp.float32)[:, None] * freqs[None, :]
    emb = jnp.concatenate([jnp.sin(args), jnp.cos(args)], axis=1)
    if dim % 2 == 1:
        emb = jnp.concatenate([emb, jnp.zeros((num_embeddings, 1), jnp.float32)], axis=1)
    emb = emb.at[padding_idx].set(0.0)
    return emb


def make_positions(tokens, padding_idx=0):
    """fairseq utils.make_positions: pad -> padding_idx, others count up."""
    nonpad = (tokens != padding_idx).astype(jnp.int32)
    return jnp.cumsum(nonpad, axis=1) * nonpad + padding_idx


def init_params(key, num_layers=2):
    H, F, V = HIDDEN, FFN, VOCAB
    keys = jax.random.split(key, 2 + num_layers)

    def lin(k, fan_in, shape):
        return jax.random.normal(k, shape, jnp.float32) / math.sqrt(fan_in)

    params = {
        "token_emb": jax.random.normal(keys[0], (NUM_TOK_EMB, H), jnp.float32) * 0.02,
        "pos_table": sinusoidal_table(64, H, padding_idx=0),
        "layers": [],
    }
    for i in range(num_layers):
        lk = jax.random.split(keys[1 + i], 6)
        params["layers"].append(dict(
            ln1_g=jnp.ones((1, H), jnp.float32), ln1_b=jnp.zeros((1, H), jnp.float32),
            wq=lin(lk[0], H, (H, H)), bq=jnp.zeros((1, H), jnp.float32),
            wk=lin(lk[1], H, (H, H)), bk=jnp.zeros((1, H), jnp.float32),
            wv=lin(lk[2], H, (H, H)), bv=jnp.zeros((1, H), jnp.float32),
            wo=lin(lk[3], H, (H, H)), bo=jnp.zeros((1, H), jnp.float32),
            ln2_g=jnp.ones((1, H), jnp.float32), ln2_b=jnp.zeros((1, H), jnp.float32),
            w1=lin(lk[4], H, (H, F)), b1=jnp.zeros((1, F), jnp.float32),
            w2=lin(lk[5], F, (F, H)), b2=jnp.zeros((1, H), jnp.float32),
        ))
    fk = jax.random.split(keys[-1], 3)
    params["final"] = dict(
        w_scale=lin(fk[0], H, (H, H)), b_scale=jnp.ones((1, H), jnp.float32),
        w_bias=lin(fk[1], H, (H, H)), b_bias=jnp.zeros((1, H), jnp.float32),
        w_proj=lin(fk[2], H, (H, V)), b_proj=jnp.zeros((1, V), jnp.float32),
    )
    return params


def ar_duration_predictor_forward(params, enc_output, mask, dur_gt, condition):
    """Mirrors ARDurationPredictor.forward (eval mode: dropout = identity)."""
    B, T, H = enc_output.shape

    # dur_gt = clamp(dur_gt, 0, max_duration); previous = [SOS, dur_gt[:, :-1]]
    dur_gt_c = jnp.clip(dur_gt, 0, MAX_DURATION)
    sos = jnp.full((B, 1), SOS_DURATION, dtype=dur_gt_c.dtype)
    prev = jnp.concatenate([sos, dur_gt_c[:, :-1]], axis=1)

    # sinusoidal positional embedding (fairseq semantics) + token embedding
    pos_idx = make_positions(prev, padding_idx=0)
    positions = params["pos_table"][pos_idx]                      # (B,T,H)
    tok = params["token_emb"][prev] * math.sqrt(H)                # (B,T,H)
    x = (enc_output + positions) + tok                            # dropout: identity

    # mask-derived kernel inputs (no lane-width-1 tensors)
    pad = mask.astype(jnp.float32)                                # (B,T) 1.0 = padded
    keep = jnp.broadcast_to((1.0 - pad)[:, :, None], (B, T, H)).reshape(B * T, H)
    kbias = (pad * NEG).reshape(B, 1, T)
    cond_flat = jnp.broadcast_to(condition[:, None, :], (B, T, H)).reshape(B * T, H)

    wslab, bslab, fw, fb = pack_params(params)

    out = run_fused_decoder(x.reshape(B * T, H), keep, kbias, cond_flat,
                            wslab, bslab, fw, fb)                 # (B*T, 128)
    logits = out.reshape(B, T, LANES)[:, :, :VOCAB]               # (B, T, 33)
    return logits, dur_gt_c


# ---------------- demo ----------------
if __name__ == "__main__":
    key = jax.random.PRNGKey(0)
    B, T, H = 2, 8, HIDDEN
    k1, k2, k3, k4 = jax.random.split(key, 4)

    params = init_params(k1, num_layers=2)

    enc_output = jax.random.normal(k2, (B, T, H), jnp.float32)
    dur_gt = jax.random.randint(k3, (B, T), 0, 40, dtype=jnp.int32)   # will be clamped
    mask = jnp.zeros((B, T), dtype=bool).at[1, T - 3:].set(True)      # pad last 3 of batch 1
    condition = jax.random.normal(k4, (B, H), jnp.float32)

    fwd = jax.jit(ar_duration_predictor_forward)
    logits, dur_clipped = fwd(params, enc_output, mask, dur_gt, condition)
    jax.block_until_ready((logits, dur_clipped))

    assert logits.shape == (B, T, VOCAB)
    assert dur_clipped.shape == (B, T)
    assert bool(jnp.all(jnp.isfinite(logits)))
    print("KERNEL_OK")
</pallas_src>

<mosaic_0001>
module attributes {stable_mosaic.version = 11 : i64} {
  func.func @fused_decoder_kernel(%arg0: i32, %arg1: memref<16x32xf32, #tpu.memory_space<vmem>>, %arg2: memref<16x32xf32, #tpu.memory_space<vmem>>, %arg3: memref<2x1x8xf32, #tpu.memory_space<vmem>>, %arg4: memref<16x32xf32, #tpu.memory_space<vmem>>, %arg5: memref<2x224x128xf32, #tpu.memory_space<vmem>>, %arg6: memref<2x64x128xf32, #tpu.memory_space<vmem>>, %arg7: memref<96x128xf32, #tpu.memory_space<vmem>>, %arg8: memref<24x128xf32, #tpu.memory_space<vmem>>, %arg9: memref<16x128xf32, #tpu.memory_space<vmem>>) attributes {dimension_semantics = [#tpu.dimension_semantics<arbitrary>], iteration_bounds = array<i64: 1>, scalar_prefetch = 0 : i64, scratch_operands = 0 : i64, tpu.core_type = #tpu.core_type<tc>, window_params = [{pipeline_mode = #tpu.pipeline_mode<synchronous>, transform_indices = @transform_0, window_bounds = array<i64: 16, 32>}, {pipeline_mode = #tpu.pipeline_mode<synchronous>, transform_indices = @transform_1, window_bounds = array<i64: 16, 32>}, {pipeline_mode = #tpu.pipeline_mode<synchronous>, transform_indices = @transform_2, window_bounds = array<i64: 2, 1, 8>}, {pipeline_mode = #tpu.pipeline_mode<synchronous>, transform_indices = @transform_3, window_bounds = array<i64: 16, 32>}, {pipeline_mode = #tpu.pipeline_mode<synchronous>, transform_indices = @transform_4, window_bounds = array<i64: 2, 224, 128>}, {pipeline_mode = #tpu.pipeline_mode<synchronous>, transform_indices = @transform_5, window_bounds = array<i64: 2, 64, 128>}, {pipeline_mode = #tpu.pipeline_mode<synchronous>, transform_indices = @transform_6, window_bounds = array<i64: 96, 128>}, {pipeline_mode = #tpu.pipeline_mode<synchronous>, transform_indices = @transform_7, window_bounds = array<i64: 24, 128>}, {pipeline_mode = #tpu.pipeline_mode<synchronous>, transform_indices = @transform_8, window_bounds = array<i64: 16, 128>}]} {
    %c0 = arith.constant 0 : index
    %c0_0 = arith.constant 0 : index
    %0 = vector.load %arg1[%c0, %c0_0] : memref<16x32xf32, #tpu.memory_space<vmem>>, vector<16x32xf32>
    %c0_1 = arith.constant 0 : index
    %c0_2 = arith.constant 0 : index
    %1 = vector.load %arg2[%c0_1, %c0_2] : memref<16x32xf32, #tpu.memory_space<vmem>>, vector<16x32xf32>
    %2 = tpu.iota {dimensions = array<i32: 0>} : vector<8x8xi32>
    %3 = tpu.iota {dimensions = array<i32: 1>} : vector<8x8xi32>
    %4 = arith.cmpi sgt, %3, %2 : vector<8x8xi32>
    %cst = arith.constant -1.000000e+09 : f32
    %cst_3 = arith.constant 0.000000e+00 : f32
    %5 = vector.broadcast %cst : f32 to vector<8x8xf32>
    %6 = vector.broadcast %cst_3 : f32 to vector<8x8xf32>
    %7 = arith.select %4, %5, %6 : vector<8x8xi1>, vector<8x8xf32>
    %c0_4 = arith.constant 0 : index
    %c0_5 = arith.constant 0 : index
    %c0_6 = arith.constant 0 : index
    %8 = vector.load %arg5[%c0_4, %c0_5, %c0_6] : memref<2x224x128xf32, #tpu.memory_space<vmem>>, vector<1x224x128xf32>
    %9 = vector.shape_cast %8 : vector<1x224x128xf32> to vector<224x128xf32>
    %c0_7 = arith.constant 0 : index
    %c0_8 = arith.constant 0 : index
    %c0_9 = arith.constant 0 : index
    %10 = vector.load %arg6[%c0_7, %c0_8, %c0_9] : memref<2x64x128xf32, #tpu.memory_space<vmem>>, vector<1x64x128xf32>
    %11 = vector.shape_cast %10 : vector<1x64x128xf32> to vector<64x128xf32>
    %12 = vector.extract_strided_slice %9 {offsets = [0, 0], sizes = [32, 96], strides = [1, 1]} : vector<224x128xf32> to vector<32x96xf32>
    %13 = vector.extract_strided_slice %9 {offsets = [32, 0], sizes = [32, 32], strides = [1, 1]} : vector<224x128xf32> to vector<32x32xf32>
    %14 = vector.extract_strided_slice %9 {offsets = [64, 0], sizes = [32, 128], strides = [1, 1]} : vector<224x128xf32> to vector<32x128xf32>
    %15 = vector.extract_strided_slice %9 {offsets = [96, 0], sizes = [128, 32], strides = [1, 1]} : vector<224x128xf32> to vector<128x32xf32>
    %16 = vector.extract_strided_slice %11 {offsets = [0, 0], sizes = [1, 32], strides = [1, 1]} : vector<64x128xf32> to vector<1x32xf32>
    %17 = vector.extract_strided_slice %11 {offsets = [8, 0], sizes = [1, 32], strides = [1, 1]} : vector<64x128xf32> to vector<1x32xf32>
    %18 = vector.extract_strided_slice %11 {offsets = [16, 0], sizes = [1, 96], strides = [1, 1]} : vector<64x128xf32> to vector<1x96xf32>
    %19 = vector.extract_strided_slice %11 {offsets = [24, 0], sizes = [1, 32], strides = [1, 1]} : vector<64x128xf32> to vector<1x32xf32>
    %20 = vector.extract_strided_slice %11 {offsets = [32, 0], sizes = [1, 32], strides = [1, 1]} : vector<64x128xf32> to vector<1x32xf32>
    %21 = vector.extract_strided_slice %11 {offsets = [40, 0], sizes = [1, 32], strides = [1, 1]} : vector<64x128xf32> to vector<1x32xf32>
    %22 = vector.extract_strided_slice %11 {offsets = [48, 0], sizes = [1, 128], strides = [1, 1]} : vector<64x128xf32> to vector<1x128xf32>
    %23 = vector.extract_strided_slice %11 {offsets = [56, 0], sizes = [1, 32], strides = [1, 1]} : vector<64x128xf32> to vector<1x32xf32>
    %cst_10 = arith.constant dense<0.000000e+00> : vector<16xf32>
    %24 = vector.multi_reduction <add>, %0, %cst_10 [1] : vector<16x32xf32> to vector<16xf32>
    %25 = vector.shape_cast %24 : vector<16xf32> to vector<16x1xf32>
    %cst_11 = arith.constant 3.200000e+01 : f32
    %26 = vector.broadcast %cst_11 : f32 to vector<16x1xf32>
    %27 = arith.divf %25, %26 : vector<16x1xf32>
    %28 = vector.broadcast %27 : vector<16x1xf32> to vector<16x32xf32>
    %29 = arith.subf %0, %28 : vector<16x32xf32>
    %30 = arith.mulf %29, %29 : vector<16x32xf32>
    %cst_12 = arith.constant dense<0.000000e+00> : vector<16xf32>
    %31 = vector.multi_reduction <add>, %30, %cst_12 [1] : vector<16x32xf32> to vector<16xf32>
    %32 = vector.shape_cast %31 : vector<16xf32> to vector<16x1xf32>
    %cst_13 = arith.constant 3.200000e+01 : f32
    %33 = vector.broadcast %cst_13 : f32 to vector<16x1xf32>
    %34 = arith.divf %32, %33 : vector<16x1xf32>
    %35 = vector.broadcast %27 : vector<16x1xf32> to vector<16x32xf32>
    %36 = arith.subf %0, %35 : vector<16x32xf32>
    %cst_14 = arith.constant 9.99999974E-6 : f32
    %37 = vector.broadcast %cst_14 : f32 to vector<16x1xf32>
    %38 = arith.addf %34, %37 : vector<16x1xf32>
    %39 = math.rsqrt %38 : vector<16x1xf32>
    %40 = vector.broadcast %39 : vector<16x1xf32> to vector<16x32xf32>
    %41 = arith.mulf %36, %40 : vector<16x32xf32>
    %42 = vector.broadcast %16 : vector<1x32xf32> to vector<16x32xf32>
    %43 = arith.mulf %41, %42 : vector<16x32xf32>
    %44 = vector.broadcast %17 : vector<1x32xf32> to vector<16x32xf32>
    %45 = arith.addf %43, %44 : vector<16x32xf32>
    %cst_15 = arith.constant dense<0.000000e+00> : vector<16x96xf32>
    %46 = tpu.matmul %45, %12, %cst_15 {dimension_numbers = #tpu.dot_dimension_numbers<[1], [0], [0], [1], [0, 0, 1, 1], [], []>} : vector<16x32xf32>, vector<32x96xf32>, vector<16x96xf32> -> vector<16x96xf32>
    %47 = vector.broadcast %18 : vector<1x96xf32> to vector<16x96xf32>
    %48 = arith.addf %46, %47 : vector<16x96xf32>
    %c0_16 = arith.constant 0 : index
    %c0_17 = arith.constant 0 : index
    %c0_18 = arith.constant 0 : index
    %49 = vector.load %arg3[%c0_16, %c0_17, %c0_18] : memref<2x1x8xf32, #tpu.memory_space<vmem>>, vector<1x1x8xf32>
    %50 = vector.shape_cast %49 : vector<1x1x8xf32> to vector<1x8xf32>
    %51 = vector.broadcast %50 : vector<1x8xf32> to vector<8x8xf32>
    %52 = arith.addf %7, %51 : vector<8x8xf32>
    %53 = vector.extract_strided_slice %48 {offsets = [0, 0], sizes = [8, 32], strides = [1, 1]} : vector<16x96xf32> to vector<8x32xf32>
    %cst_19 = arith.constant 2.500000e-01 : f32
    %54 = vector.broadcast %cst_19 : f32 to vector<8x32xf32>
    %55 = arith.mulf %53, %54 : vector<8x32xf32>
    %56 = vector.extract_strided_slice %48 {offsets = [0, 32], sizes = [8, 32], strides = [1, 1]} : vector<16x96xf32> to vector<8x32xf32>
    %57 = vector.extract_strided_slice %48 {offsets = [0, 64], sizes = [8, 32], strides = [1, 1]} : vector<16x96xf32> to vector<8x32xf32>
    %58 = vector.extract_strided_slice %55 {offsets = [0, 0], sizes = [8, 16], strides = [1, 1]} : vector<8x32xf32> to vector<8x16xf32>
    %59 = vector.extract_strided_slice %56 {offsets = [0, 0], sizes = [8, 16], strides = [1, 1]} : vector<8x32xf32> to vector<8x16xf32>
    %60 = tpu.transpose %59, [1, 0] : vector<8x16xf32> -> vector<16x8xf32>
    %cst_20 = arith.constant dense<0.000000e+00> : vector<8x8xf32>
    %61 = tpu.matmul %58, %60, %cst_20 {dimension_numbers = #tpu.dot_dimension_numbers<[1], [0], [0], [1], [0, 0, 1, 1], [], []>} : vector<8x16xf32>, vector<16x8xf32>, vector<8x8xf32> -> vector<8x8xf32>
    %62 = arith.addf %61, %52 : vector<8x8xf32>
    %cst_21 = arith.constant dense<0xFF800000> : vector<8xf32>
    %63 = vector.multi_reduction <maximumf>, %62, %cst_21 [1] : vector<8x8xf32> to vector<8xf32>
    %64 = vector.shape_cast %63 : vector<8xf32> to vector<8x1xf32>
    %65 = vector.broadcast %64 : vector<8x1xf32> to vector<8x8xf32>
    %66 = arith.subf %62, %65 : vector<8x8xf32>
    %67 = math.exp %66 : vector<8x8xf32>
    %cst_22 = arith.constant dense<0.000000e+00> : vector<8xf32>
    %68 = vector.multi_reduction <add>, %67, %cst_22 [1] : vector<8x8xf32> to vector<8xf32>
    %69 = vector.shape_cast %68 : vector<8xf32> to vector<8x1xf32>
    %70 = tpu.reciprocal %69 {approx = true} : vector<8x1xf32> -> vector<8x1xf32>
    %71 = vector.broadcast %70 : vector<8x1xf32> to vector<8x8xf32>
    %72 = arith.mulf %67, %71 : vector<8x8xf32>
    %73 = vector.extract_strided_slice %57 {offsets = [0, 0], sizes = [8, 16], strides = [1, 1]} : vector<8x32xf32> to vector<8x16xf32>
    %cst_23 = arith.constant dense<0.000000e+00> : vector<8x16xf32>
    %74 = tpu.matmul %72, %73, %cst_23 {dimension_numbers = #tpu.dot_dimension_numbers<[1], [0], [0], [1], [0, 0, 1, 1], [], []>} : vector<8x8xf32>, vector<8x16xf32>, vector<8x16xf32> -> vector<8x16xf32>
    %75 = vector.extract_strided_slice %55 {offsets = [0, 16], sizes = [8, 16], strides = [1, 1]} : vector<8x32xf32> to vector<8x16xf32>
    %76 = vector.extract_strided_slice %56 {offsets = [0, 16], sizes = [8, 16], strides = [1, 1]} : vector<8x32xf32> to vector<8x16xf32>
    %77 = tpu.transpose %76, [1, 0] : vector<8x16xf32> -> vector<16x8xf32>
    %cst_24 = arith.constant dense<0.000000e+00> : vector<8x8xf32>
    %78 = tpu.matmul %75, %77, %cst_24 {dimension_numbers = #tpu.dot_dimension_numbers<[1], [0], [0], [1], [0, 0, 1, 1], [], []>} : vector<8x16xf32>, vector<16x8xf32>, vector<8x8xf32> -> vector<8x8xf32>
    %79 = arith.addf %78, %52 : vector<8x8xf32>
    %cst_25 = arith.constant dense<0xFF800000> : vector<8xf32>
    %80 = vector.multi_reduction <maximumf>, %79, %cst_25 [1] : vector<8x8xf32> to vector<8xf32>
    %81 = vector.shape_cast %80 : vector<8xf32> to vector<8x1xf32>
    %82 = vector.broadcast %81 : vector<8x1xf32> to vector<8x8xf32>
    %83 = arith.subf %79, %82 : vector<8x8xf32>
    %84 = math.exp %83 : vector<8x8xf32>
    %cst_26 = arith.constant dense<0.000000e+00> : vector<8xf32>
    %85 = vector.multi_reduction <add>, %84, %cst_26 [1] : vector<8x8xf32> to vector<8xf32>
    %86 = vector.shape_cast %85 : vector<8xf32> to vector<8x1xf32>
    %87 = tpu.reciprocal %86 {approx = true} : vector<8x1xf32> -> vector<8x1xf32>
    %88 = vector.broadcast %87 : vector<8x1xf32> to vector<8x8xf32>
    %89 = arith.mulf %84, %88 : vector<8x8xf32>
    %90 = vector.extract_strided_slice %57 {offsets = [0, 16], sizes = [8, 16], strides = [1, 1]} : vector<8x32xf32> to vector<8x16xf32>
    %cst_27 = arith.constant dense<0.000000e+00> : vector<8x16xf32>
    %91 = tpu.matmul %89, %90, %cst_27 {dimension_numbers = #tpu.dot_dimension_numbers<[1], [0], [0], [1], [0, 0, 1, 1], [], []>} : vector<8x8xf32>, vector<8x16xf32>, vector<8x16xf32> -> vector<8x16xf32>
    %92 = tpu.concatenate %74, %91 in 1 : vector<8x16xf32>, vector<8x16xf32> -> vector<8x32xf32>
    %c1 = arith.constant 1 : index
    %c0_28 = arith.constant 0 : index
    %c0_29 = arith.constant 0 : index
    %93 = vector.load %arg3[%c1, %c0_28, %c0_29] : memref<2x1x8xf32, #tpu.memory_space<vmem>>, vector<1x1x8xf32>
    %94 = vector.shape_cast %93 : vector<1x1x8xf32> to vector<1x8xf32>
    %95 = vector.broadcast %94 : vector<1x8xf32> to vector<8x8xf32>
    %96 = arith.addf %7, %95 : vector<8x8xf32>
    %97 = vector.extract_strided_slice %48 {offsets = [8, 0], sizes = [8, 32], strides = [1, 1]} : vector<16x96xf32> to vector<8x32xf32>
    %cst_30 = arith.constant 2.500000e-01 : f32
    %98 = vector.broadcast %cst_30 : f32 to vector<8x32xf32>
    %99 = arith.mulf %97, %98 : vector<8x32xf32>
    %100 = vector.extract_strided_slice %48 {offsets = [8, 32], sizes = [8, 32], strides = [1, 1]} : vector<16x96xf32> to vector<8x32xf32>
    %101 = vector.extract_strided_slice %48 {offsets = [8, 64], sizes = [8, 32], strides = [1, 1]} : vector<16x96xf32> to vector<8x32xf32>
    %102 = vector.extract_strided_slice %99 {offsets = [0, 0], sizes = [8, 16], strides = [1, 1]} : vector<8x32xf32> to vector<8x16xf32>
    %103 = vector.extract_strided_slice %100 {offsets = [0, 0], sizes = [8, 16], strides = [1, 1]} : vector<8x32xf32> to vector<8x16xf32>
    %104 = tpu.transpose %103, [1, 0] : vector<8x16xf32> -> vector<16x8xf32>
    %cst_31 = arith.constant dense<0.000000e+00> : vector<8x8xf32>
    %105 = tpu.matmul %102, %104, %cst_31 {dimension_numbers = #tpu.dot_dimension_numbers<[1], [0], [0], [1], [0, 0, 1, 1], [], []>} : vector<8x16xf32>, vector<16x8xf32>, vector<8x8xf32> -> vector<8x8xf32>
    %106 = arith.addf %105, %96 : vector<8x8xf32>
    %cst_32 = arith.constant dense<0xFF800000> : vector<8xf32>
    %107 = vector.multi_reduction <maximumf>, %106, %cst_32 [1] : vector<8x8xf32> to vector<8xf32>
    %108 = vector.shape_cast %107 : vector<8xf32> to vector<8x1xf32>
    %109 = vector.broadcast %108 : vector<8x1xf32> to vector<8x8xf32>
    %110 = arith.subf %106, %109 : vector<8x8xf32>
    %111 = math.exp %110 : vector<8x8xf32>
    %cst_33 = arith.constant dense<0.000000e+00> : vector<8xf32>
    %112 = vector.multi_reduction <add>, %111, %cst_33 [1] : vector<8x8xf32> to vector<8xf32>
    %113 = vector.shape_cast %112 : vector<8xf32> to vector<8x1xf32>
    %114 = tpu.reciprocal %113 {approx = true} : vector<8x1xf32> -> vector<8x1xf32>
    %115 = vector.broadcast %114 : vector<8x1xf32> to vector<8x8xf32>
    %116 = arith.mulf %111, %115 : vector<8x8xf32>
    %117 = vector.extract_strided_slice %101 {offsets = [0, 0], sizes = [8, 16], strides = [1, 1]} : vector<8x32xf32> to vector<8x16xf32>
    %cst_34 = arith.constant dense<0.000000e+00> : vector<8x16xf32>
    %118 = tpu.matmul %116, %117, %cst_34 {dimension_numbers = #tpu.dot_dimension_numbers<[1], [0], [0], [1], [0, 0, 1, 1], [], []>} : vector<8x8xf32>, vector<8x16xf32>, vector<8x16xf32> -> vector<8x16xf32>
    %119 = vector.extract_strided_slice %99 {offsets = [0, 16], sizes = [8, 16], strides = [1, 1]} : vector<8x32xf32> to vector<8x16xf32>
    %120 = vector.extract_strided_slice %100 {offsets = [0, 16], sizes = [8, 16], strides = [1, 1]} : vector<8x32xf32> to vector<8x16xf32>
    %121 = tpu.transpose %120, [1, 0] : vector<8x16xf32> -> vector<16x8xf32>
    %cst_35 = arith.constant dense<0.000000e+00> : vector<8x8xf32>
    %122 = tpu.matmul %119, %121, %cst_35 {dimension_numbers = #tpu.dot_dimension_numbers<[1], [0], [0], [1], [0, 0, 1, 1], [], []>} : vector<8x16xf32>, vector<16x8xf32>, vector<8x8xf32> -> vector<8x8xf32>
    %123 = arith.addf %122, %96 : vector<8x8xf32>
    %cst_36 = arith.constant dense<0xFF800000> : vector<8xf32>
    %124 = vector.multi_reduction <maximumf>, %123, %cst_36 [1] : vector<8x8xf32> to vector<8xf32>
    %125 = vector.shape_cast %124 : vector<8xf32> to vector<8x1xf32>
    %126 = vector.broadcast %125 : vector<8x1xf32> to vector<8x8xf32>
    %127 = arith.subf %123, %126 : vector<8x8xf32>
    %128 = math.exp %127 : vector<8x8xf32>
    %cst_37 = arith.constant dense<0.000000e+00> : vector<8xf32>
    %129 = vector.multi_reduction <add>, %128, %cst_37 [1] : vector<8x8xf32> to vector<8xf32>
    %130 = vector.shape_cast %129 : vector<8xf32> to vector<8x1xf32>
    %131 = tpu.reciprocal %130 {approx = true} : vector<8x1xf32> -> vector<8x1xf32>
    %132 = vector.broadcast %131 : vector<8x1xf32> to vector<8x8xf32>
    %133 = arith.mulf %128, %132 : vector<8x8xf32>
    %134 = vector.extract_strided_slice %101 {offsets = [0, 16], sizes = [8, 16], strides = [1, 1]} : vector<8x32xf32> to vector<8x16xf32>
    %cst_38 = arith.constant dense<0.000000e+00> : vector<8x16xf32>
    %135 = tpu.matmul %133, %134, %cst_38 {dimension_numbers = #tpu.dot_dimension_numbers<[1], [0], [0], [1], [0, 0, 1, 1], [], []>} : vector<8x8xf32>, vector<8x16xf32>, vector<8x16xf32> -> vector<8x16xf32>
    %136 = tpu.concatenate %118, %135 in 1 : vector<8x16xf32>, vector<8x16xf32> -> vector<8x32xf32>
    %137 = tpu.concatenate %92, %136 in 0 : vector<8x32xf32>, vector<8x32xf32> -> vector<16x32xf32>
    %cst_39 = arith.constant dense<0.000000e+00> : vector<16x32xf32>
    %138 = tpu.matmul %137, %13, %cst_39 {dimension_numbers = #tpu.dot_dimension_numbers<[1], [0], [0], [1], [0, 0, 1, 1], [], []>} : vector<16x32xf32>, vector<32x32xf32>, vector<16x32xf32> -> vector<16x32xf32>
    %139 = vector.broadcast %19 : vector<1x32xf32> to vector<16x32xf32>
    %140 = arith.addf %138, %139 : vector<16x32xf32>
    %141 = arith.addf %0, %140 : vector<16x32xf32>
    %142 = arith.mulf %141, %1 : vector<16x32xf32>
    %cst_40 = arith.constant dense<0.000000e+00> : vector<16xf32>
    %143 = vector.multi_reduction <add>, %142, %cst_40 [1] : vector<16x32xf32> to vector<16xf32>
    %144 = vector.shape_cast %143 : vector<16xf32> to vector<16x1xf32>
    %cst_41 = arith.constant 3.200000e+01 : f32
    %145 = vector.broadcast %cst_41 : f32 to vector<16x1xf32>
    %146 = arith.divf %144, %145 : vector<16x1xf32>
    %147 = vector.broadcast %146 : vector<16x1xf32> to vector<16x32xf32>
    %148 = arith.subf %142, %147 : vector<16x32xf32>
    %149 = arith.mulf %148, %148 : vector<16x32xf32>
    %cst_42 = arith.constant dense<0.000000e+00> : vector<16xf32>
    %150 = vector.multi_reduction <add>, %149, %cst_42 [1] : vector<16x32xf32> to vector<16xf32>
    %151 = vector.shape_cast %150 : vector<16xf32> to vector<16x1xf32>
    %cst_43 = arith.constant 3.200000e+01 : f32
    %152 = vector.broadcast %cst_43 : f32 to vector<16x1xf32>
    %153 = arith.divf %151, %152 : vector<16x1xf32>
    %154 = vector.broadcast %146 : vector<16x1xf32> to vector<16x32xf32>
    %155 = arith.subf %142, %154 : vector<16x32xf32>
    %cst_44 = arith.constant 9.99999974E-6 : f32
    %156 = vector.broadcast %cst_44 : f32 to vector<16x1xf32>
    %157 = arith.addf %153, %156 : vector<16x1xf32>
    %158 = math.rsqrt %157 : vector<16x1xf32>
    %159 = vector.broadcast %158 : vector<16x1xf32> to vector<16x32xf32>
    %160 = arith.mulf %155, %159 : vector<16x32xf32>
    %161 = vector.broadcast %20 : vector<1x32xf32> to vector<16x32xf32>
    %162 = arith.mulf %160, %161 : vector<16x32xf32>
    %163 = vector.broadcast %21 : vector<1x32xf32> to vector<16x32xf32>
    %164 = arith.addf %162, %163 : vector<16x32xf32>
    %cst_45 = arith.constant dense<0.000000e+00> : vector<16x128xf32>
    %165 = tpu.matmul %164, %14, %cst_45 {dimension_numbers = #tpu.dot_dimension_numbers<[1], [0], [0], [1], [0, 0, 1, 1], [], []>} : vector<16x32xf32>, vector<32x128xf32>, vector<16x128xf32> -> vector<16x128xf32>
    %166 = vector.broadcast %22 : vector<1x128xf32> to vector<16x128xf32>
    %167 = arith.addf %165, %166 : vector<16x128xf32>
    %cst_46 = arith.constant 0.000000e+00 : f32
    %168 = vector.broadcast %cst_46 : f32 to vector<16x128xf32>
    %169 = arith.maximumf %167, %168 : vector<16x128xf32>
    %cst_47 = arith.constant dense<0.000000e+00> : vector<16x32xf32>
    %170 = tpu.matmul %169, %15, %cst_47 {dimension_numbers = #tpu.dot_dimension_numbers<[1], [0], [0], [1], [0, 0, 1, 1], [], []>} : vector<16x128xf32>, vector<128x32xf32>, vector<16x32xf32> -> vector<16x32xf32>
    %171 = vector.broadcast %23 : vector<1x32xf32> to vector<16x32xf32>
    %172 = arith.addf %170, %171 : vector<16x32xf32>
    %173 = arith.addf %142, %172 : vector<16x32xf32>
    %174 = arith.mulf %173, %1 : vector<16x32xf32>
    %c1_48 = arith.constant 1 : index
    %c0_49 = arith.constant 0 : index
    %c0_50 = arith.constant 0 : index
    %175 = vector.load %arg5[%c1_48, %c0_49, %c0_50] : memref<2x224x128xf32, #tpu.memory_space<vmem>>, vector<1x224x128xf32>
    %176 = vector.shape_cast %175 : vector<1x224x128xf32> to vector<224x128xf32>
    %c1_51 = arith.constant 1 : index
    %c0_52 = arith.constant 0 : index
    %c0_53 = arith.constant 0 : index
    %177 = vector.load %arg6[%c1_51, %c0_52, %c0_53] : memref<2x64x128xf32, #tpu.memory_space<vmem>>, vector<1x64x128xf32>
    %178 = vector.shape_cast %177 : vector<1x64x128xf32> to vector<64x128xf32>
    %179 = vector.extract_strided_slice %176 {offsets = [0, 0], sizes = [32, 96], strides = [1, 1]} : vector<224x128xf32> to vector<32x96xf32>
    %180 = vector.extract_strided_slice %176 {offsets = [32, 0], sizes = [32, 32], strides = [1, 1]} : vector<224x128xf32> to vector<32x32xf32>
    %181 = vector.extract_strided_slice %176 {offsets = [64, 0], sizes = [32, 128], strides = [1, 1]} : vector<224x128xf32> to vector<32x128xf32>
    %182 = vector.extract_strided_slice %176 {offsets = [96, 0], sizes = [128, 32], strides = [1, 1]} : vector<224x128xf32> to vector<128x32xf32>
    %183 = vector.extract_strided_slice %178 {offsets = [0, 0], sizes = [1, 32], strides = [1, 1]} : vector<64x128xf32> to vector<1x32xf32>
    %184 = vector.extract_strided_slice %178 {offsets = [8, 0], sizes = [1, 32], strides = [1, 1]} : vector<64x128xf32> to vector<1x32xf32>
    %185 = vector.extract_strided_slice %178 {offsets = [16, 0], sizes = [1, 96], strides = [1, 1]} : vector<64x128xf32> to vector<1x96xf32>
    %186 = vector.extract_strided_slice %178 {offsets = [24, 0], sizes = [1, 32], strides = [1, 1]} : vector<64x128xf32> to vector<1x32xf32>
    %187 = vector.extract_strided_slice %178 {offsets = [32, 0], sizes = [1, 32], strides = [1, 1]} : vector<64x128xf32> to vector<1x32xf32>
    %188 = vector.extract_strided_slice %178 {offsets = [40, 0], sizes = [1, 32], strides = [1, 1]} : vector<64x128xf32> to vector<1x32xf32>
    %189 = vector.extract_strided_slice %178 {offsets = [48, 0], sizes = [1, 128], strides = [1, 1]} : vector<64x128xf32> to vector<1x128xf32>
    %190 = vector.extract_strided_slice %178 {offsets = [56, 0], sizes = [1, 32], strides = [1, 1]} : vector<64x128xf32> to vector<1x32xf32>
    %cst_54 = arith.constant dense<0.000000e+00> : vector<16xf32>
    %191 = vector.multi_reduction <add>, %174, %cst_54 [1] : vector<16x32xf32> to vector<16xf32>
    %192 = vector.shape_cast %191 : vector<16xf32> to vector<16x1xf32>
    %cst_55 = arith.constant 3.200000e+01 : f32
    %193 = vector.broadcast %cst_55 : f32 to vector<16x1xf32>
    %194 = arith.divf %192, %193 : vector<16x1xf32>
    %195 = vector.broadcast %194 : vector<16x1xf32> to vector<16x32xf32>
    %196 = arith.subf %174, %195 : vector<16x32xf32>
    %197 = arith.mulf %196, %196 : vector<16x32xf32>
    %cst_56 = arith.constant dense<0.000000e+00> : vector<16xf32>
    %198 = vector.multi_reduction <add>, %197, %cst_56 [1] : vector<16x32xf32> to vector<16xf32>
    %199 = vector.shape_cast %198 : vector<16xf32> to vector<16x1xf32>
    %cst_57 = arith.constant 3.200000e+01 : f32
    %200 = vector.broadcast %cst_57 : f32 to vector<16x1xf32>
    %201 = arith.divf %199, %200 : vector<16x1xf32>
    %202 = vector.broadcast %194 : vector<16x1xf32> to vector<16x32xf32>
    %203 = arith.subf %174, %202 : vector<16x32xf32>
    %cst_58 = arith.constant 9.99999974E-6 : f32
    %204 = vector.broadcast %cst_58 : f32 to vector<16x1xf32>
    %205 = arith.addf %201, %204 : vector<16x1xf32>
    %206 = math.rsqrt %205 : vector<16x1xf32>
    %207 = vector.broadcast %206 : vector<16x1xf32> to vector<16x32xf32>
    %208 = arith.mulf %203, %207 : vector<16x32xf32>
    %209 = vector.broadcast %183 : vector<1x32xf32> to vector<16x32xf32>
    %210 = arith.mulf %208, %209 : vector<16x32xf32>
    %211 = vector.broadcast %184 : vector<1x32xf32> to vector<16x32xf32>
    %212 = arith.addf %210, %211 : vector<16x32xf32>
    %cst_59 = arith.constant dense<0.000000e+00> : vector<16x96xf32>
    %213 = tpu.matmul %212, %179, %cst_59 {dimension_numbers = #tpu.dot_dimension_numbers<[1], [0], [0], [1], [0, 0, 1, 1], [], []>} : vector<16x32xf32>, vector<32x96xf32>, vector<16x96xf32> -> vector<16x96xf32>
    %214 = vector.broadcast %185 : vector<1x96xf32> to vector<16x96xf32>
    %215 = arith.addf %213, %214 : vector<16x96xf32>
    %c0_60 = arith.constant 0 : index
    %c0_61 = arith.constant 0 : index
    %c0_62 = arith.constant 0 : index
    %216 = vector.load %arg3[%c0_60, %c0_61, %c0_62] : memref<2x1x8xf32, #tpu.memory_space<vmem>>, vector<1x1x8xf32>
    %217 = vector.shape_cast %216 : vector<1x1x8xf32> to vector<1x8xf32>
    %218 = vector.broadcast %217 : vector<1x8xf32> to vector<8x8xf32>
    %219 = arith.addf %7, %218 : vector<8x8xf32>
    %220 = vector.extract_strided_slice %215 {offsets = [0, 0], sizes = [8, 32], strides = [1, 1]} : vector<16x96xf32> to vector<8x32xf32>
    %cst_63 = arith.constant 2.500000e-01 : f32
    %221 = vector.broadcast %cst_63 : f32 to vector<8x32xf32>
    %222 = arith.mulf %220, %221 : vector<8x32xf32>
    %223 = vector.extract_strided_slice %215 {offsets = [0, 32], sizes = [8, 32], strides = [1, 1]} : vector<16x96xf32> to vector<8x32xf32>
    %224 = vector.extract_strided_slice %215 {offsets = [0, 64], sizes = [8, 32], strides = [1, 1]} : vector<16x96xf32> to vector<8x32xf32>
    %225 = vector.extract_strided_slice %222 {offsets = [0, 0], sizes = [8, 16], strides = [1, 1]} : vector<8x32xf32> to vector<8x16xf32>
    %226 = vector.extract_strided_slice %223 {offsets = [0, 0], sizes = [8, 16], strides = [1, 1]} : vector<8x32xf32> to vector<8x16xf32>
    %227 = tpu.transpose %226, [1, 0] : vector<8x16xf32> -> vector<16x8xf32>
    %cst_64 = arith.constant dense<0.000000e+00> : vector<8x8xf32>
    %228 = tpu.matmul %225, %227, %cst_64 {dimension_numbers = #tpu.dot_dimension_numbers<[1], [0], [0], [1], [0, 0, 1, 1], [], []>} : vector<8x16xf32>, vector<16x8xf32>, vector<8x8xf32> -> vector<8x8xf32>
    %229 = arith.addf %228, %219 : vector<8x8xf32>
    %cst_65 = arith.constant dense<0xFF800000> : vector<8xf32>
    %230 = vector.multi_reduction <maximumf>, %229, %cst_65 [1] : vector<8x8xf32> to vector<8xf32>
    %231 = vector.shape_cast %230 : vector<8xf32> to vector<8x1xf32>
    %232 = vector.broadcast %231 : vector<8x1xf32> to vector<8x8xf32>
    %233 = arith.subf %229, %232 : vector<8x8xf32>
    %234 = math.exp %233 : vector<8x8xf32>
    %cst_66 = arith.constant dense<0.000000e+00> : vector<8xf32>
    %235 = vector.multi_reduction <add>, %234, %cst_66 [1] : vector<8x8xf32> to vector<8xf32>
    %236 = vector.shape_cast %235 : vector<8xf32> to vector<8x1xf32>
    %237 = tpu.reciprocal %236 {approx = true} : vector<8x1xf32> -> vector<8x1xf32>
    %238 = vector.broadcast %237 : vector<8x1xf32> to vector<8x8xf32>
    %239 = arith.mulf %234, %238 : vector<8x8xf32>
    %240 = vector.extract_strided_slice %224 {offsets = [0, 0], sizes = [8, 16], strides = [1, 1]} : vector<8x32xf32> to vector<8x16xf32>
    %cst_67 = arith.constant dense<0.000000e+00> : vector<8x16xf32>
    %241 = tpu.matmul %239, %240, %cst_67 {dimension_numbers = #tpu.dot_dimension_numbers<[1], [0], [0], [1], [0, 0, 1, 1], [], []>} : vector<8x8xf32>, vector<8x16xf32>, vector<8x16xf32> -> vector<8x16xf32>
    %242 = vector.extract_strided_slice %222 {offsets = [0, 16], sizes = [8, 16], strides = [1, 1]} : vector<8x32xf32> to vector<8x16xf32>
    %243 = vector.extract_strided_slice %223 {offsets = [0, 16], sizes = [8, 16], strides = [1, 1]} : vector<8x32xf32> to vector<8x16xf32>
    %244 = tpu.transpose %243, [1, 0] : vector<8x16xf32> -> vector<16x8xf32>
    %cst_68 = arith.constant dense<0.000000e+00> : vector<8x8xf32>
    %245 = tpu.matmul %242, %244, %cst_68 {dimension_numbers = #tpu.dot_dimension_numbers<[1], [0], [0], [1], [0, 0, 1, 1], [], []>} : vector<8x16xf32>, vector<16x8xf32>, vector<8x8xf32> -> vector<8x8xf32>
    %246 = arith.addf %245, %219 : vector<8x8xf32>
    %cst_69 = arith.constant dense<0xFF800000> : vector<8xf32>
    %247 = vector.multi_reduction <maximumf>, %246, %cst_69 [1] : vector<8x8xf32> to vector<8xf32>
    %248 = vector.shape_cast %247 : vector<8xf32> to vector<8x1xf32>
    %249 = vector.broadcast %248 : vector<8x1xf32> to vector<8x8xf32>
    %250 = arith.subf %246, %249 : vector<8x8xf32>
    %251 = math.exp %250 : vector<8x8xf32>
    %cst_70 = arith.constant dense<0.000000e+00> : vector<8xf32>
    %252 = vector.multi_reduction <add>, %251, %cst_70 [1] : vector<8x8xf32> to vector<8xf32>
    %253 = vector.shape_cast %252 : vector<8xf32> to vector<8x1xf32>
    %254 = tpu.reciprocal %253 {approx = true} : vector<8x1xf32> -> vector<8x1xf32>
    %255 = vector.broadcast %254 : vector<8x1xf32> to vector<8x8xf32>
    %256 = arith.mulf %251, %255 : vector<8x8xf32>
    %257 = vector.extract_strided_slice %224 {offsets = [0, 16], sizes = [8, 16], strides = [1, 1]} : vector<8x32xf32> to vector<8x16xf32>
    %cst_71 = arith.constant dense<0.000000e+00> : vector<8x16xf32>
    %258 = tpu.matmul %256, %257, %cst_71 {dimension_numbers = #tpu.dot_dimension_numbers<[1], [0], [0], [1], [0, 0, 1, 1], [], []>} : vector<8x8xf32>, vector<8x16xf32>, vector<8x16xf32> -> vector<8x16xf32>
    %259 = tpu.concatenate %241, %258 in 1 : vector<8x16xf32>, vector<8x16xf32> -> vector<8x32xf32>
    %c1_72 = arith.constant 1 : index
    %c0_73 = arith.constant 0 : index
    %c0_74 = arith.constant 0 : index
    %260 = vector.load %arg3[%c1_72, %c0_73, %c0_74] : memref<2x1x8xf32, #tpu.memory_space<vmem>>, vector<1x1x8xf32>
    %261 = vector.shape_cast %260 : vector<1x1x8xf32> to vector<1x8xf32>
    %262 = vector.broadcast %261 : vector<1x8xf32> to vector<8x8xf32>
    %263 = arith.addf %7, %262 : vector<8x8xf32>
    %264 = vector.extract_strided_slice %215 {offsets = [8, 0], sizes = [8, 32], strides = [1, 1]} : vector<16x96xf32> to vector<8x32xf32>
    %cst_75 = arith.constant 2.500000e-01 : f32
    %265 = vector.broadcast %cst_75 : f32 to vector<8x32xf32>
    %266 = arith.mulf %264, %265 : vector<8x32xf32>
    %267 = vector.extract_strided_slice %215 {offsets = [8, 32], sizes = [8, 32], strides = [1, 1]} : vector<16x96xf32> to vector<8x32xf32>
    %268 = vector.extract_strided_slice %215 {offsets = [8, 64], sizes = [8, 32], strides = [1, 1]} : vector<16x96xf32> to vector<8x32xf32>
    %269 = vector.extract_strided_slice %266 {offsets = [0, 0], sizes = [8, 16], strides = [1, 1]} : vector<8x32xf32> to vector<8x16xf32>
    %270 = vector.extract_strided_slice %267 {offsets = [0, 0], sizes = [8, 16], strides = [1, 1]} : vector<8x32xf32> to vector<8x16xf32>
    %271 = tpu.transpose %270, [1, 0] : vector<8x16xf32> -> vector<16x8xf32>
    %cst_76 = arith.constant dense<0.000000e+00> : vector<8x8xf32>
    %272 = tpu.matmul %269, %271, %cst_76 {dimension_numbers = #tpu.dot_dimension_numbers<[1], [0], [0], [1], [0, 0, 1, 1], [], []>} : vector<8x16xf32>, vector<16x8xf32>, vector<8x8xf32> -> vector<8x8xf32>
    %273 = arith.addf %272, %263 : vector<8x8xf32>
    %cst_77 = arith.constant dense<0xFF800000> : vector<8xf32>
    %274 = vector.multi_reduction <maximumf>, %273, %cst_77 [1] : vector<8x8xf32> to vector<8xf32>
    %275 = vector.shape_cast %274 : vector<8xf32> to vector<8x1xf32>
    %276 = vector.broadcast %275 : vector<8x1xf32> to vector<8x8xf32>
    %277 = arith.subf %273, %276 : vector<8x8xf32>
    %278 = math.exp %277 : vector<8x8xf32>
    %cst_78 = arith.constant dense<0.000000e+00> : vector<8xf32>
    %279 = vector.multi_reduction <add>, %278, %cst_78 [1] : vector<8x8xf32> to vector<8xf32>
    %280 = vector.shape_cast %279 : vector<8xf32> to vector<8x1xf32>
    %281 = tpu.reciprocal %280 {approx = true} : vector<8x1xf32> -> vector<8x1xf32>
    %282 = vector.broadcast %281 : vector<8x1xf32> to vector<8x8xf32>
    %283 = arith.mulf %278, %282 : vector<8x8xf32>
    %284 = vector.extract_strided_slice %268 {offsets = [0, 0], sizes = [8, 16], strides = [1, 1]} : vector<8x32xf32> to vector<8x16xf32>
    %cst_79 = arith.constant dense<0.000000e+00> : vector<8x16xf32>
    %285 = tpu.matmul %283, %284, %cst_79 {dimension_numbers = #tpu.dot_dimension_numbers<[1], [0], [0], [1], [0, 0, 1, 1], [], []>} : vector<8x8xf32>, vector<8x16xf32>, vector<8x16xf32> -> vector<8x16xf32>
    %286 = vector.extract_strided_slice %266 {offsets = [0, 16], sizes = [8, 16], strides = [1, 1]} : vector<8x32xf32> to vector<8x16xf32>
    %287 = vector.extract_strided_slice %267 {offsets = [0, 16], sizes = [8, 16], strides = [1, 1]} : vector<8x32xf32> to vector<8x16xf32>
    %288 = tpu.transpose %287, [1, 0] : vector<8x16xf32> -> vector<16x8xf32>
    %cst_80 = arith.constant dense<0.000000e+00> : vector<8x8xf32>
    %289 = tpu.matmul %286, %288, %cst_80 {dimension_numbers = #tpu.dot_dimension_numbers<[1], [0], [0], [1], [0, 0, 1, 1], [], []>} : vector<8x16xf32>, vector<16x8xf32>, vector<8x8xf32> -> vector<8x8xf32>
    %290 = arith.addf %289, %263 : vector<8x8xf32>
    %cst_81 = arith.constant dense<0xFF800000> : vector<8xf32>
    %291 = vector.multi_reduction <maximumf>, %290, %cst_81 [1] : vector<8x8xf32> to vector<8xf32>
    %292 = vector.shape_cast %291 : vector<8xf32> to vector<8x1xf32>
    %293 = vector.broadcast %292 : vector<8x1xf32> to vector<8x8xf32>
    %294 = arith.subf %290, %293 : vector<8x8xf32>
    %295 = math.exp %294 : vector<8x8xf32>
    %cst_82 = arith.constant dense<0.000000e+00> : vector<8xf32>
    %296 = vector.multi_reduction <add>, %295, %cst_82 [1] : vector<8x8xf32> to vector<8xf32>
    %297 = vector.shape_cast %296 : vector<8xf32> to vector<8x1xf32>
    %298 = tpu.reciprocal %297 {approx = true} : vector<8x1xf32> -> vector<8x1xf32>
    %299 = vector.broadcast %298 : vector<8x1xf32> to vector<8x8xf32>
    %300 = arith.mulf %295, %299 : vector<8x8xf32>
    %301 = vector.extract_strided_slice %268 {offsets = [0, 16], sizes = [8, 16], strides = [1, 1]} : vector<8x32xf32> to vector<8x16xf32>
    %cst_83 = arith.constant dense<0.000000e+00> : vector<8x16xf32>
    %302 = tpu.matmul %300, %301, %cst_83 {dimension_numbers = #tpu.dot_dimension_numbers<[1], [0], [0], [1], [0, 0, 1, 1], [], []>} : vector<8x8xf32>, vector<8x16xf32>, vector<8x16xf32> -> vector<8x16xf32>
    %303 = tpu.concatenate %285, %302 in 1 : vector<8x16xf32>, vector<8x16xf32> -> vector<8x32xf32>
    %304 = tpu.concatenate %259, %303 in 0 : vector<8x32xf32>, vector<8x32xf32> -> vector<16x32xf32>
    %cst_84 = arith.constant dense<0.000000e+00> : vector<16x32xf32>
    %305 = tpu.matmul %304, %180, %cst_84 {dimension_numbers = #tpu.dot_dimension_numbers<[1], [0], [0], [1], [0, 0, 1, 1], [], []>} : vector<16x32xf32>, vector<32x32xf32>, vector<16x32xf32> -> vector<16x32xf32>
    %306 = vector.broadcast %186 : vector<1x32xf32> to vector<16x32xf32>
    %307 = arith.addf %305, %306 : vector<16x32xf32>
    %308 = arith.addf %174, %307 : vector<16x32xf32>
    %309 = arith.mulf %308, %1 : vector<16x32xf32>
    %cst_85 = arith.constant dense<0.000000e+00> : vector<16xf32>
    %310 = vector.multi_reduction <add>, %309, %cst_85 [1] : vector<16x32xf32> to vector<16xf32>
    %311 = vector.shape_cast %310 : vector<16xf32> to vector<16x1xf32>
    %cst_86 = arith.constant 3.200000e+01 : f32
    %312 = vector.broadcast %cst_86 : f32 to vector<16x1xf32>
    %313 = arith.divf %311, %312 : vector<16x1xf32>
    %314 = vector.broadcast %313 : vector<16x1xf32> to vector<16x32xf32>
    %315 = arith.subf %309, %314 : vector<16x32xf32>
    %316 = arith.mulf %315, %315 : vector<16x32xf32>
    %cst_87 = arith.constant dense<0.000000e+00> : vector<16xf32>
    %317 = vector.multi_reduction <add>, %316, %cst_87 [1] : vector<16x32xf32> to vector<16xf32>
    %318 = vector.shape_cast %317 : vector<16xf32> to vector<16x1xf32>
    %cst_88 = arith.constant 3.200000e+01 : f32
    %319 = vector.broadcast %cst_88 : f32 to vector<16x1xf32>
    %320 = arith.divf %318, %319 : vector<16x1xf32>
    %321 = vector.broadcast %313 : vector<16x1xf32> to vector<16x32xf32>
    %322 = arith.subf %309, %321 : vector<16x32xf32>
    %cst_89 = arith.constant 9.99999974E-6 : f32
    %323 = vector.broadcast %cst_89 : f32 to vector<16x1xf32>
    %324 = arith.addf %320, %323 : vector<16x1xf32>
    %325 = math.rsqrt %324 : vector<16x1xf32>
    %326 = vector.broadcast %325 : vector<16x1xf32> to vector<16x32xf32>
    %327 = arith.mulf %322, %326 : vector<16x32xf32>
    %328 = vector.broadcast %187 : vector<1x32xf32> to vector<16x32xf32>
    %329 = arith.mulf %327, %328 : vector<16x32xf32>
    %330 = vector.broadcast %188 : vector<1x32xf32> to vector<16x32xf32>
    %331 = arith.addf %329, %330 : vector<16x32xf32>
    %cst_90 = arith.constant dense<0.000000e+00> : vector<16x128xf32>
    %332 = tpu.matmul %331, %181, %cst_90 {dimension_numbers = #tpu.dot_dimension_numbers<[1], [0], [0], [1], [0, 0, 1, 1], [], []>} : vector<16x32xf32>, vector<32x128xf32>, vector<16x128xf32> -> vector<16x128xf32>
    %333 = vector.broadcast %189 : vector<1x128xf32> to vector<16x128xf32>
    %334 = arith.addf %332, %333 : vector<16x128xf32>
    %cst_91 = arith.constant 0.000000e+00 : f32
    %335 = vector.broadcast %cst_91 : f32 to vector<16x128xf32>
    %336 = arith.maximumf %334, %335 : vector<16x128xf32>
    %cst_92 = arith.constant dense<0.000000e+00> : vector<16x32xf32>
    %337 = tpu.matmul %336, %182, %cst_92 {dimension_numbers = #tpu.dot_dimension_numbers<[1], [0], [0], [1], [0, 0, 1, 1], [], []>} : vector<16x128xf32>, vector<128x32xf32>, vector<16x32xf32> -> vector<16x32xf32>
    %338 = vector.broadcast %190 : vector<1x32xf32> to vector<16x32xf32>
    %339 = arith.addf %337, %338 : vector<16x32xf32>
    %340 = arith.addf %309, %339 : vector<16x32xf32>
    %341 = arith.mulf %340, %1 : vector<16x32xf32>
    %c0_93 = arith.constant 0 : index
    %c0_94 = arith.constant 0 : index
    %342 = vector.load %arg7[%c0_93, %c0_94] : memref<96x128xf32, #tpu.memory_space<vmem>>, vector<96x128xf32>
    %c0_95 = arith.constant 0 : index
    %c0_96 = arith.constant 0 : index
    %343 = vector.load %arg8[%c0_95, %c0_96] : memref<24x128xf32, #tpu.memory_space<vmem>>, vector<24x128xf32>
    %344 = vector.extract_strided_slice %342 {offsets = [0, 0], sizes = [32, 32], strides = [1, 1]} : vector<96x128xf32> to vector<32x32xf32>
    %345 = vector.extract_strided_slice %342 {offsets = [32, 0], sizes = [32, 32], strides = [1, 1]} : vector<96x128xf32> to vector<32x32xf32>
    %346 = vector.extract_strided_slice %342 {offsets = [64, 0], sizes = [32, 128], strides = [1, 1]} : vector<96x128xf32> to vector<32x128xf32>
    %347 = vector.extract_strided_slice %343 {offsets = [0, 0], sizes = [1, 32], strides = [1, 1]} : vector<24x128xf32> to vector<1x32xf32>
    %348 = vector.extract_strided_slice %343 {offsets = [8, 0], sizes = [1, 32], strides = [1, 1]} : vector<24x128xf32> to vector<1x32xf32>
    %349 = vector.extract_strided_slice %343 {offsets = [16, 0], sizes = [1, 128], strides = [1, 1]} : vector<24x128xf32> to vector<1x128xf32>
    %c0_97 = arith.constant 0 : index
    %c0_98 = arith.constant 0 : index
    %350 = vector.load %arg4[%c0_97, %c0_98] : memref<16x32xf32, #tpu.memory_space<vmem>>, vector<16x32xf32>
    %cst_99 = arith.constant dense<0.000000e+00> : vector<16xf32>
    %351 = vector.multi_reduction <add>, %341, %cst_99 [1] : vector<16x32xf32> to vector<16xf32>
    %352 = vector.shape_cast %351 : vector<16xf32> to vector<16x1xf32>
    %cst_100 = arith.constant 3.200000e+01 : f32
    %353 = vector.broadcast %cst_100 : f32 to vector<16x1xf32>
    %354 = arith.divf %352, %353 : vector<16x1xf32>
    %355 = vector.broadcast %354 : vector<16x1xf32> to vector<16x32xf32>
    %356 = arith.subf %341, %355 : vector<16x32xf32>
    %357 = arith.mulf %356, %356 : vector<16x32xf32>
    %cst_101 = arith.constant dense<0.000000e+00> : vector<16xf32>
    %358 = vector.multi_reduction <add>, %357, %cst_101 [1] : vector<16x32xf32> to vector<16xf32>
    %359 = vector.shape_cast %358 : vector<16xf32> to vector<16x1xf32>
    %cst_102 = arith.constant 3.200000e+01 : f32
    %360 = vector.broadcast %cst_102 : f32 to vector<16x1xf32>
    %361 = arith.divf %359, %360 : vector<16x1xf32>
    %362 = vector.broadcast %354 : vector<16x1xf32> to vector<16x32xf32>
    %363 = arith.subf %341, %362 : vector<16x32xf32>
    %cst_103 = arith.constant 9.99999974E-6 : f32
    %364 = vector.broadcast %cst_103 : f32 to vector<16x1xf32>
    %365 = arith.addf %361, %364 : vector<16x1xf32>
    %366 = math.rsqrt %365 : vector<16x1xf32>
    %367 = vector.broadcast %366 : vector<16x1xf32> to vector<16x32xf32>
    %368 = arith.mulf %363, %367 : vector<16x32xf32>
    %cst_104 = arith.constant dense<0.000000e+00> : vector<16x32xf32>
    %369 = tpu.matmul %350, %344, %cst_104 {dimension_numbers = #tpu.dot_dimension_numbers<[1], [0], [0], [1], [0, 0, 1, 1], [], []>} : vector<16x32xf32>, vector<32x32xf32>, vector<16x32xf32> -> vector<16x32xf32>
    %370 = vector.broadcast %347 : vector<1x32xf32> to vector<16x32xf32>
    %371 = arith.addf %369, %370 : vector<16x32xf32>
    %cst_105 = arith.constant dense<0.000000e+00> : vector<16x32xf32>
    %372 = tpu.matmul %350, %345, %cst_105 {dimension_numbers = #tpu.dot_dimension_numbers<[1], [0], [0], [1], [0, 0, 1, 1], [], []>} : vector<16x32xf32>, vector<32x32xf32>, vector<16x32xf32> -> vector<16x32xf32>
    %373 = vector.broadcast %348 : vector<1x32xf32> to vector<16x32xf32>
    %374 = arith.addf %372, %373 : vector<16x32xf32>
    %375 = arith.mulf %368, %371 : vector<16x32xf32>
    %376 = arith.addf %375, %374 : vector<16x32xf32>
    %cst_106 = arith.constant dense<0.000000e+00> : vector<16x128xf32>
    %377 = tpu.matmul %376, %346, %cst_106 {dimension_numbers = #tpu.dot_dimension_numbers<[1], [0], [0], [1], [0, 0, 1, 1], [], []>} : vector<16x32xf32>, vector<32x128xf32>, vector<16x128xf32> -> vector<16x128xf32>
    %378 = vector.broadcast %349 : vector<1x128xf32> to vector<16x128xf32>
    %379 = arith.addf %377, %378 : vector<16x128xf32>
    %c0_107 = arith.constant 0 : index
    %c0_108 = arith.constant 0 : index
    %380 = vector.load %arg9[%c0_107, %c0_108] : memref<16x128xf32, #tpu.memory_space<vmem>>, vector<16x128xf32>
    tpu.vector_store %arg9[%c0_107, %c0_108], %379 {strides = array<i32>} : memref<16x128xf32, #tpu.memory_space<vmem>>, vector<16x128xf32>,
    return
  }
  func.func @transform_0(%arg0: i32) -> (i32, i32) {
    %c0_i32 = arith.constant 0 : i32
    %c0_i32_0 = arith.constant 0 : i32
    %c0_i32_1 = arith.constant 0 : i32
    return %c0_i32, %c0_i32_0 : i32, i32
  }
  func.func @transform_1(%arg0: i32) -> (i32, i32) {
    %c0_i32 = arith.constant 0 : i32
    %c0_i32_0 = arith.constant 0 : i32
    %c0_i32_1 = arith.constant 0 : i32
    return %c0_i32, %c0_i32_0 : i32, i32
  }
  func.func @transform_2(%arg0: i32) -> (i32, i32, i32) {
    %c0_i32 = arith.constant 0 : i32
    %c0_i32_0 = arith.constant 0 : i32
    %c0_i32_1 = arith.constant 0 : i32
    %c0_i32_2 = arith.constant 0 : i32
    return %c0_i32, %c0_i32_0, %c0_i32_1 : i32, i32, i32
  }
  func.func @transform_3(%arg0: i32) -> (i32, i32) {
    %c0_i32 = arith.constant 0 : i32
    %c0_i32_0 = arith.constant 0 : i32
    %c0_i32_1 = arith.constant 0 : i32
    return %c0_i32, %c0_i32_0 : i32, i32
  }
  func.func @transform_4(%arg0: i32) -> (i32, i32, i32) {
    %c0_i32 = arith.constant 0 : i32
    %c0_i32_0 = arith.constant 0 : i32
    %c0_i32_1 = arith.constant 0 : i32
    %c0_i32_2 = arith.constant 0 : i32
    return %c0_i32, %c0_i32_0, %c0_i32_1 : i32, i32, i32
  }
  func.func @transform_5(%arg0: i32) -> (i32, i32, i32) {
    %c0_i32 = arith.constant 0 : i32
    %c0_i32_0 = arith.constant 0 : i32
    %c0_i32_1 = arith.constant 0 : i32
    %c0_i32_2 = arith.constant 0 : i32
    return %c0_i32, %c0_i32_0, %c0_i32_1 : i32, i32, i32
  }
  func.func @transform_6(%arg0: i32) -> (i32, i32) {
    %c0_i32 = arith.constant 0 : i32
    %c0_i32_0 = arith.constant 0 : i32
    %c0_i32_1 = arith.constant 0 : i32
    return %c0_i32, %c0_i32_0 : i32, i32
  }
  func.func @transform_7(%arg0: i32) -> (i32, i32) {
    %c0_i32 = arith.constant 0 : i32
    %c0_i32_0 = arith.constant 0 : i32
    %c0_i32_1 = arith.constant 0 : i32
    return %c0_i32, %c0_i32_0 : i32, i32
  }
  func.func @transform_8(%arg0: i32) -> (i32, i32) {
    %c0_i32 = arith.constant 0 : i32
    %c0_i32_0 = arith.constant 0 : i32
    %c0_i32_1 = arith.constant 0 : i32
    return %c0_i32, %c0_i32_0 : i32, i32
  }
}

</mosaic_0001>

<bundles_post_ra>
// kernel: ar_duration_predictor_forward.1
= control target key start
LH: loop header
LB: loop body
LE: loop exit
PB: predicated region body
PF: predicated region fallthrough
CT: control target
= control target key end

     0   :  { %vm76_vm0 = vcmask 261120   ;;  %s3798_s0 = inlined_call_operand.vmem [shape: f32[16,32], index: 0, kind: input, shape index: {}]   ;;  %s3799_s1 = inlined_call_operand.vmem [shape: f32[16,32], index: 1, kind: input, shape index: {}]   ;;  %s3800_s2 = inlined_call_operand.vmem [shape: f32[2,1,8], index: 2, kind: input, shape index: {}]   ;;  %s3801_s3 = inlined_call_operand.vmem [shape: f32[16,32], index: 3, kind: input, shape index: {}]   ;;  %s3802_s4 = inlined_call_operand.vmem [shape: f32[2,224,128], index: 4, kind: input, shape index: {}]   ;;  %s3803_s5 = inlined_call_operand.vmem [shape: f32[2,64,128], index: 5, kind: input, shape index: {}]   ;;  %s3804_s6 = inlined_call_operand.vmem [shape: f32[96,128], index: 6, kind: input, shape index: {}]   ;;  %s3805_s7 = inlined_call_operand.vmem [shape: f32[24,128], index: 7, kind: input, shape index: {}]   ;;  %s3806_s8 = inlined_call_operand.hbm [shape: f32[16,128], index: 8, kind: output, shape index: {}]  }
   0x1   :  { %v3229_v0 = vld [vmem:[%s3798_s0] sm:$0xff]  ;;  %v3234_v1 = vld [vmem:[%s3798_s0 + $0x8] sm:$0xff] }
   0x2   :  { %13 = vsyncpa [#allocation3], 0  ;;  %v77_v2 = vsel %vm76_vm0, %v3229_v0, 0.0  ;;  %v80_v3 = vsel %vm76_vm0, %v3234_v1, 0.0  ;;  %v43_v14 = vld [vmem:[%s3802_s4 + $0x18] sm:$0xff]  ;;  %v42_v15 = vld [vmem:[%s3802_s4 + $0x10] sm:$0xff]  ;;  %v34_v23 = vlaneseq }
   0x3   :  { %78 = vadd.xlane.f32.xlu0 %v77_v2  ;;  %2836 = vmatprep.subr.mxu0 %v43_v14  ;;  %v41_v16 = vld [vmem:[%s3802_s4 + $0x8] sm:$0xff]  ;;  %v40_v17 = vld [vmem:[%s3802_s4] sm:$0xff]  ;;  %v3170_v39 = vmov 0.0   ;;  %vm3171_vm1 = vmmov 0   ;;  %v70_v40 = vld [vmem:[%s3803_s5 + $0x10] sm:$0xff]  ;;  %s3172_s22 = smov 96  }
   0x4   :  { %2837 = vmatpush3.msra.mxu0 %v43_v14  ;;  %v35_v25 = vshrl.u32 %v34_v23, 7  ;;  %v68_v27 = vld [vmem:[%s3803_s5] sm:$0xff]  ;;  %v69_v28 = vld [vmem:[%s3803_s5 + $0x8] sm:$0xff]  ;;  %2847 = vmatprep.subr.mxu1 %v3170_v39  ;;  %s3173_s23 = smov 80   ;;  %s3174_s24 = smov 112   ;;  %vm213_vm2 = vcmask 130048  }
   0x5   :  { %2838 = vmatprep.subr.mxu0 %v42_v15  ;;  %2849 = vmatprep.mubr.msk.f32.mxu1 %vm3171_vm1, %v3170_v39  ;;  %v37_v51 = vand.u32 127, %v34_v23  ;;  %v2635_v53 = vld [vmem:[%s3800_s2] ss:$0 sm:$0xff]  ;;  %vm289_vm4 = vcmask 64512   ;;  %v2643_v58 = vld [vmem:[%s3800_s2 + $0x1] ss:$0 sm:$0xff] }
   0x6   :  { %2839 = vmatpush3.msra.mxu0 %v42_v15  ;;  %v3256_v26 = vsub.s32 0, %v35_v25  ;;  %s3175_s29 = smov 64   ;;  %s3176_s2 = smov 48  }
   0x7   :  { %81 = vadd.xlane.f32.xlu0 %v80_v3  ;;  %2840 = vmatprep.subr.mxu0 %v41_v16  ;;  %vm38_vm3 = vcmp.gt.s32.totalorder %v37_v51, %v35_v25  ;;  %s3177_s15 = smov 16   ;;  %s3178_s13 = smov [#allocation2]  }
   0x8   :  { %2841 = vmatpush3.msra.mxu0 %v41_v16  ;;  %v107_v29 = vrot.slane %v68_v27, %v3256_v26  ;;  %v113_v32 = vrot.slane %v69_v28, %v3256_v26  ;;  %v119_v42 = vrot.slane %v70_v40, %v3256_v26  ;;  %v39_v52 = vsel %vm38_vm3, -1e+09, %v3170_v39  ;;  %s2622_s14 = sshll.u32 %s3178_s13, 4  ;;  %s2623_s14 = int_to_ptr.vmem [resolvable:$true] %s2622_s14 }
   0x9   :  { %2842 = vmatprep.subr.mxu0 %v40_v17  ;;  %v3305_v54 = vadd.f32 %v2635_v53, %v39_v52  ;;  %v3312_v60 = vadd.f32 %v2643_v58, %v39_v52  ;;  %v44_v58 = vld [vmem:[%s3802_s4 + $0x20] sm:$0xff]  ;;  %s3148_s16 = scalar_lea.vmem %s2623_s14, 256  ;;  %p3153_p1 = scmp.lt.s32.totalorder %s2623_s14, %s2623_s14 }
   0xa   :  { %2843 = vmatpush3.msra.mxu0 %v40_v17  ;;  %p3149_p0 = scmp.ne.s32.totalorder %s2623_s14, %s3148_s16  ;;  %p3154_p2 = scmp.lt.s32.totalorder %s3148_s16, %s3148_s16 }
   0xb   :  { %2867 = vmatprep.subr.mxu0 %v3170_v39 }
   0xc   :  { %p3155_p3 = por %p3154_p2, %p3153_p1 }
   0xe   :  { %p3156_p4 = pnand %p3155_p3, %p3149_p0 }
  0x8c   :  { %v79_v4 = vpop.xlane.xlu0 %78 }
  0x8d   :  { %v84_v5 = vmul.f32 0.03125, %v79_v4 }
  0x8f   :  { %v86_v6 = vsub.f32 %v3229_v0, %v84_v5 }
  0x90   :  { %v82_v7 = vpop.xlane.xlu0 %81 }
  0x91   :  { %v85_v8 = vmul.f32 0.03125, %v82_v7  ;;  %v88_v9 = vmul.f32 %v86_v6, %v86_v6 }
  0x93   :  { %v87_v10 = vsub.f32 %v3234_v1, %v85_v8  ;;  %v90_v11 = vsel %vm76_vm0, %v88_v9, 0.0 }
  0x94   :  { %91 = vadd.xlane.f32.xlu1 %v90_v11 }
  0x95   :  { %v89_v12 = vmul.f32 %v87_v10, %v87_v10 }
  0x97   :  { %v93_v13 = vsel %vm76_vm0, %v89_v12, 0.0 }
  0x98   :  { %94 = vadd.xlane.f32.xlu1 %v93_v13 }
 0x11d   :  { %v92_v18 = vpop.xlane.xlu1 %91 }
 0x11e   :  { %v96_v19 = vmul.f32 0.03125, %v92_v18 }
 0x120   :  { %v98_v20 = vadd.f32 1e-05, %v96_v19 }
 0x121   :  { %v95_v21 = vpop.xlane.xlu1 %94 }
 0x122   :  { %3096 = vrsqrt.f32 %v98_v20  ;;  %v97_v22 = vmul.f32 0.03125, %v95_v21 }
 0x124   :  { %v99_v24 = vadd.f32 1e-05, %v97_v22 }
 0x126   :  { %3098 = vrsqrt.f32 %v99_v24 }
 0x12f   :  { %v3097_v30 = vpop.eup %3096 }
 0x130   :  { %v102_v31 = vmul.f32 %v3097_v30, %v86_v6 }
 0x132   :  { %v108_v33 = vmul.f32 %v107_v29, %v102_v31 }
 0x133   :  { %v3099_v34 = vpop.eup %3098 }
 0x134   :  { %v103_v35 = vmul.f32 %v3099_v34, %v87_v10  ;;  %v114_v36 = vadd.f32 %v113_v32, %v108_v33 }
 0x136   :  { %v109_v37 = vmul.f32 %v107_v29, %v103_v35  ;;  %2844 = vmatprep.mubr.msk.f32.mxu0 %vm76_vm0, %v114_v36 }
 0x138   :  { %v115_v38 = vadd.f32 %v113_v32, %v109_v37 }
 0x13a   :  { %2845 = vmatmul.mubr.msk.f32.vlgmr.msra.gmra.mxu0 %vm76_vm0, %v115_v38 }
 0x13b   :  { %2869 = vmatprep.mubr.msk.f32.mxu0 %vm3171_vm1, %v3170_v39 }
 0x1fa   :  { %v2846_v41 = vpop.f32.mrf.mxu0 }
 0x1fb   :  { %v3284_v45 = vadd.f32 %v2846_v41, %v119_v42 }
 0x1fc   :  { %v192_v43 = vpop.f32.mrf.mxu0 }
 0x1fd   :  { %v3278_v44 = vadd.f32 %v192_v43, %v119_v42  ;;  %v556_v46 = vmul.f32 0.25, %v3284_v45 }
 0x1ff   :  { %211 = vrot.lane.b32.xlu0 %v3278_v44, %s3172_s22  ;;  %v209_v48 = vmul.f32 0.25, %v3278_v44 }
 0x203   :  { %379 = vrot.lane.b32.xlu0 %v3278_v44, %s3173_s23 }
 0x207   :  { %558 = vrot.lane.b32.xlu0 %v3284_v45, %s3172_s22 }
 0x20b   :  { %722 = vrot.lane.b32.xlu0 %v556_v46, %s3174_s24 }
 0x271   :  { %v212_v47 = vpop.permute.xlu0 %211 }
 0x272   :  { %2848 = vmatpush3.xpose.msk.msra.mxu1 %vm213_vm2, %v212_v47 }
 0x273   :  { %2852 = vmatprep.subr.mxu1 %v3170_v39 }
 0x275   :  { %v380_v49 = vpop.permute.xlu0 %379  ;;  %2850 = vmatmul.mubr.msk.f32.vlgmr.msra.gmra.mxu1 %vm213_vm2, %v209_v48 }
 0x276   :  { %2854 = vmatprep.mubr.msk.f32.mxu1 %vm3171_vm1, %v3170_v39 }
 0x279   :  { %v559_v50 = vpop.permute.xlu0 %558 }
 0x27a   :  { %2868 = vmatpush3.xpose.msk.msra.mxu0 %vm213_vm2, %v559_v50 }
 0x27b   :  { %2877 = vmatprep.subr.mxu0 %v3170_v39 }
 0x27d   :  { %2870 = vmatmul.mubr.msk.f32.vlgmr.msra.gmra.mxu0 %vm213_vm2, %v556_v46  ;;  %v723_v12 = vpop.permute.xlu0 %722 }
 0x27e   :  { %2879 = vmatprep.mubr.msk.f32.mxu0 %vm3171_vm1, %v3170_v39 }
 0x335   :  { %v285_v55 = vpop.f32.mrf.mxu1 }
 0x336   :  { %v286_v56 = vadd.f32 %v285_v55, %v3305_v54  ;;  %v47_v55 = vld [vmem:[%s3802_s4 + $0x38] sm:$0xff] }
 0x337   :  { %v2851_v57 = vpop.f32.mrf.mxu1 }
 0x338   :  { %v290_v59 = vsel %vm289_vm4, %v286_v56, -inf  ;;  %v45_v57 = vld [vmem:[%s3802_s4 + $0x28] sm:$0xff] }
 0x339   :  { %291 = vmax.xlane.f32.xlu1 %v290_v59 }
 0x33d   :  { %v631_v61 = vpop.f32.mrf.mxu0 }
 0x33e   :  { %v632_v62 = vadd.f32 %v631_v61, %v3312_v60 }
 0x33f   :  { %v2871_v63 = vpop.f32.mrf.mxu0 }
 0x340   :  { %v635_v2 = vsel %vm289_vm4, %v632_v62, -inf }
 0x341   :  { %636 = vmax.xlane.f32.xlu0 %v635_v2 }
 0x34a   :  { %301 = vrot.lane.b32.xlu1 %v3278_v44, %s3175_s29 }
 0x3c2   :  { %v292_v3 = vpop.xlane.xlu1 %291 }
 0x3c3   :  { %v293_v4 = vsub.f32 %v286_v56, %v292_v3  ;;  %v46_v56 = vld [vmem:[%s3802_s4 + $0x30] sm:$0xff] }
 0x3c5   :  { %v294_v5 = vmul.f32 1.442695, %v293_v4 }
 0x3c6   :  { %v302_v6 = vpop.permute.xlu1 %301 }
 0x3c7   :  { %3100 = vpow2.f32 %v294_v5  ;;  %2853 = vmatpush3.msra.mxu1 %v302_v6 }
 0x3c8   :  { %2857 = vmatprep.subr.mxu1 %v3170_v39 }
 0x3ca   :  { %v637_v15 = vpop.xlane.xlu0 %636 }
 0x3cb   :  { %v638_v16 = vsub.f32 %v632_v62, %v637_v15 }
 0x3cd   :  { %v639_v17 = vmul.f32 1.442695, %v638_v16  ;;  %v3389_v16 = vld [vmem:[%s3799_s1] sm:$0xff] }
 0x3d4   :  { %v3101_v7 = vpop.eup %3100 }
 0x3d5   :  { %v296_v8 = vsel %vm289_vm4, %v3101_v7, 0.0 }
 0x3d6   :  { %297 = vadd.xlane.f32.xlu1 %v296_v8  ;;  %v71_v8 = vld [vmem:[%s3803_s5 + $0x18] sm:$0xff] }
 0x3e7   :  { %377 = vrot.lane.b32.xlu1 %v209_v48, %s3174_s24 }
 0x3eb   :  { %724 = vrot.lane.b32.xlu1 %v3284_v45, %s3173_s23 }
 0x45f   :  { %v298_v9 = vpop.xlane.xlu1 %297 }
 0x460   :  { %3102 = vrcp.f32 %v298_v9  ;;  %v895_v9 = vrot.slane %v71_v8, %v3256_v26  ;;  %v53_v8 = vld [vmem:[%s3802_s4 + $0x68] sm:$0xff] }
 0x461   :  { %3104 = vpow2.f32 %v639_v17 }
 0x463   :  { %v378_v10 = vpop.permute.xlu1 %377 }
 0x467   :  { %v725_v11 = vpop.permute.xlu1 %724 }
 0x468   :  { %2878 = vmatpush3.xpose.msk.msra.mxu0 %vm213_vm2, %v725_v11 }
 0x469   :  { %2887 = vmatprep.subr.mxu0 %v47_v55 }
 0x46b   :  { %2880 = vmatmul.mubr.msk.f32.vlgmr.msra.gmra.mxu0 %vm213_vm2, %v723_v12  ;;  %v3383_v12 = vld [vmem:[%s3799_s1 + $0x8] sm:$0xff] }
 0x46c   :  { %2888 = vmatpush3.msra.mxu0 %v47_v55  ;;  %v72_v55 = vld [vmem:[%s3803_s5 + $0x20] sm:$0xff] }
 0x46d   :  { %v3103_v13 = vpop.eup %3102  ;;  %2889 = vmatprep.subr.mxu0 %v46_v56 }
 0x46e   :  { %v300_v14 = vmul.f32 %v3103_v13, %v3101_v7  ;;  %v3105_v29 = vpop.eup %3104  ;;  %2890 = vmatpush3.msra.mxu0 %v46_v56  ;;  %v73_v56 = vld [vmem:[%s3803_s5 + $0x28] sm:$0xff] }
 0x46f   :  { %v641_v30 = vsel %vm289_vm4, %v3105_v29, 0.0  ;;  %2891 = vmatprep.subr.mxu0 %v45_v57 }
 0x470   :  { %2855 = vmatmul.mubr.msk.f32.vlgmr.msra.gmra.mxu1 %vm289_vm4, %v300_v14  ;;  %2892 = vmatpush3.msra.mxu0 %v45_v57  ;;  %v1010_v57 = vrot.slane %v72_v55, %v3256_v26 }
 0x471   :  { %2858 = vmatpush3.xpose.msk.msra.mxu1 %vm213_vm2, %v380_v49  ;;  %2859 = vmatprep.mubr.msk.f32.mxu1 %vm3171_vm1, %v3170_v39 }
 0x472   :  { %2862 = vmatprep.subr.mxu1 %v3170_v39  ;;  %2893 = vmatprep.subr.mxu0 %v44_v58 }
 0x473   :  { %2894 = vmatpush3.msra.mxu0 %v44_v58 }
 0x474   :  { %2860 = vmatmul.mubr.msk.f32.vlgmr.msra.gmra.mxu1 %vm213_vm2, %v378_v10 }
 0x475   :  { %2864 = vmatprep.mubr.msk.f32.mxu1 %vm3171_vm1, %v3170_v39 }
 0x52b   :  { %v796_v18 = vpop.f32.mrf.mxu0 }
 0x52c   :  { %v797_v19 = vadd.f32 %v796_v18, %v3312_v60 }
 0x52d   :  { %v2881_v20 = vpop.f32.mrf.mxu0 }
 0x52e   :  { %v800_v21 = vsel %vm289_vm4, %v797_v19, -inf }
 0x52f   :  { %801 = vmax.xlane.f32.xlu0 %v800_v21 }
 0x530   :  { %v3335_v22 = vpop.f32.mrf.mxu1 }
 0x532   :  { %v2856_v23 = vpop.f32.mrf.mxu1 }
 0x534   :  { %v451_v24 = vpop.f32.mrf.mxu1 }
 0x535   :  { %v452_v25 = vadd.f32 %v451_v24, %v3305_v54 }
 0x536   :  { %v2861_v27 = vpop.f32.mrf.mxu1 }
 0x537   :  { %v455_v28 = vsel %vm289_vm4, %v452_v25, -inf }
 0x538   :  { %456 = vmax.xlane.f32.xlu1 %v455_v28 }
 0x53c   :  { %642 = vadd.xlane.f32.xlu1 %v641_v30 }
 0x54d   :  { %466 = vrot.lane.b32.xlu1 %v3278_v44, %s3176_s2 }
 0x551   :  { %811 = vrot.lane.b32.xlu1 %v3284_v45, %s3176_s2 }
 0x5b8   :  { %v802_v31 = vpop.xlane.xlu0 %801 }
 0x5b9   :  { %v803_v32 = vsub.f32 %v797_v19, %v802_v31  ;;  %v51_v31 = vld [vmem:[%s3802_s4 + $0x58] sm:$0xff] }
 0x5bb   :  { %v804_v33 = vmul.f32 1.442695, %v803_v32  ;;  %v50_v32 = vld [vmem:[%s3802_s4 + $0x50] sm:$0xff] }
 0x5bd   :  { %3106 = vpow2.f32 %v804_v33  ;;  %v49_v33 = vld [vmem:[%s3802_s4 + $0x48] sm:$0xff] }
 0x5c1   :  { %v457_v34 = vpop.xlane.xlu1 %456 }
 0x5c2   :  { %v458_v35 = vsub.f32 %v452_v25, %v457_v34  ;;  %v48_v34 = vld [vmem:[%s3802_s4 + $0x40] sm:$0xff] }
 0x5c4   :  { %v459_v36 = vmul.f32 1.442695, %v458_v35  ;;  %v67_v35 = vld [vmem:[%s3802_s4 + $0xd8] sm:$0xff] }
 0x5c5   :  { %v643_v37 = vpop.xlane.xlu1 %642  ;;  %2909 = vmatprep.subr.mxu0 %v67_v35 }
 0x5c6   :  { %3108 = vpow2.f32 %v459_v36  ;;  %v66_v36 = vld [vmem:[%s3802_s4 + $0xd0] sm:$0xff] }
 0x5c9   :  { %v467_v38 = vpop.permute.xlu1 %466 }
 0x5ca   :  { %v3107_v40 = vpop.eup %3106  ;;  %2863 = vmatpush3.msra.mxu1 %v467_v38  ;;  %v64_v38 = vld [vmem:[%s3802_s4 + $0xc0] sm:$0xff] }
 0x5cb   :  { %v806_v41 = vsel %vm289_vm4, %v3107_v40, 0.0  ;;  %2872 = vmatprep.subr.mxu1 %v3170_v39 }
 0x5cc   :  { %807 = vadd.xlane.f32.xlu0 %v806_v41  ;;  %v62_v41 = vld [vmem:[%s3802_s4 + $0xb0] sm:$0xff] }
 0x5d3   :  { %v3109_v42 = vpop.eup %3108 }
 0x5d4   :  { %v461_v43 = vsel %vm289_vm4, %v3109_v42, 0.0 }
 0x5d5   :  { %462 = vadd.xlane.f32.xlu0 %v461_v43  ;;  %v60_v43 = vld [vmem:[%s3802_s4 + $0xa0] sm:$0xff] }
 0x5eb   :  { %646 = vrot.lane.b32.xlu0 %v3284_v45, %s3175_s29  ;;  %v812_v45 = vpop.permute.xlu1 %811 }
 0x655   :  { %v808_v44 = vpop.xlane.xlu0 %807 }
 0x65e   :  { %v463_v46 = vpop.xlane.xlu0 %462 }
 0x65f   :  { %3110 = vrcp.f32 %v463_v46  ;;  %v58_v46 = vld [vmem:[%s3802_s4 + $0x90] sm:$0xff] }
 0x660   :  { %3112 = vrcp.f32 %v643_v37  ;;  %v65_v37 = vld [vmem:[%s3802_s4 + $0xc8] sm:$0xff] }
 0x661   :  { %3114 = vrcp.f32 %v808_v44  ;;  %v59_v44 = vld [vmem:[%s3802_s4 + $0x98] sm:$0xff] }
 0x662   :  { %v647_v50 = vpop.permute.xlu0 %646 }
 0x66c   :  { %v3111_v47 = vpop.eup %3110 }
 0x66d   :  { %v465_v48 = vmul.f32 %v3111_v47, %v3109_v42  ;;  %v3113_v49 = vpop.eup %3112  ;;  %v61_v42 = vld [vmem:[%s3802_s4 + $0xa8] sm:$0xff] }
 0x66e   :  { %v645_v51 = vmul.f32 %v3113_v49, %v3105_v29  ;;  %v3115_v52 = vpop.eup %3114  ;;  %v57_v47 = vld [vmem:[%s3802_s4 + $0x88] sm:$0xff] }
 0x66f   :  { %2865 = vmatmul.mubr.msk.f32.vlgmr.msra.gmra.mxu1 %vm289_vm4, %v465_v48  ;;  %v810_v53 = vmul.f32 %v3115_v52, %v3107_v40  ;;  %v63_v40 = vld [vmem:[%s3802_s4 + $0xb8] sm:$0xff]  ;;  %v56_v48 = vld [vmem:[%s3802_s4 + $0x80] sm:$0xff] }
 0x670   :  { %2873 = vmatpush3.msra.mxu1 %v647_v50  ;;  %2874 = vmatprep.mubr.msk.f32.mxu1 %vm3171_vm1, %v3170_v39 }
 0x671   :  { %2882 = vmatprep.subr.mxu1 %v3170_v39 }
 0x673   :  { %2875 = vmatmul.mubr.msk.f32.vlgmr.msra.gmra.mxu1 %vm289_vm4, %v645_v51 }
 0x674   :  { %2883 = vmatpush3.msra.mxu1 %v812_v45  ;;  %2884 = vmatprep.mubr.msk.f32.mxu1 %vm3171_vm1, %v3170_v39 }
 0x675   :  { %2898 = vmatprep.subr.mxu1 %v51_v31 }
 0x677   :  { %2885 = vmatmul.mubr.msk.f32.vlgmr.msra.gmra.mxu1 %vm289_vm4, %v810_v53 }
 0x678   :  { %2899 = vmatpush3.msra.mxu1 %v51_v31 }
 0x679   :  { %2900 = vmatprep.subr.mxu1 %v50_v32 }
 0x67a   :  { %2901 = vmatpush3.msra.mxu1 %v50_v32 }
 0x67b   :  { %2902 = vmatprep.subr.mxu1 %v49_v33 }
 0x67c   :  { %2903 = vmatpush3.msra.mxu1 %v49_v33 }
 0x67d   :  { %2904 = vmatprep.subr.mxu1 %v48_v34 }
 0x67e   :  { %2905 = vmatpush3.msra.mxu1 %v48_v34 }
 0x72f   :  { %v538_v59 = vpop.f32.mrf.mxu1 }
 0x730   :  { %543 = vrot.lane.b32.xlu1 %v538_v59, %s3177_s15 }
 0x731   :  { %v2866_v61 = vpop.f32.mrf.mxu1 }
 0x732   :  { %v1016_v61 = vrot.slane %v73_v56, %v3256_v26  ;;  %v2683_v56 = vld [vmem:[%s3803_s5 + $0x48] sm:$0xff] }
 0x733   :  { %v718_v62 = vpop.f32.mrf.mxu1 }
 0x735   :  { %v2876_v63 = vpop.f32.mrf.mxu1 }
 0x737   :  { %v883_v2 = vpop.f32.mrf.mxu1 }
 0x738   :  { %888 = vrot.lane.b32.xlu1 %v883_v2, %s3177_s15 }
 0x739   :  { %v2886_v3 = vpop.f32.mrf.mxu1 }
 0x7a2   :  { %v544_v4 = vpop.permute.xlu1 %543 }
 0x7a3   :  { %v546_v5 = vsel %vm213_vm2, %v3335_v22, %v544_v4 }
 0x7a4   :  { %2895 = vmatprep.mubr.msk.f32.mxu0 %vm76_vm0, %v546_v5 }
 0x7aa   :  { %v889_v6 = vpop.permute.xlu1 %888 }
 0x7ab   :  { %v891_v7 = vsel %vm213_vm2, %v718_v62, %v889_v6  ;;  %v55_v6 = vld [vmem:[%s3802_s4 + $0x78] sm:$0xff] }
 0x7ac   :  { %2896 = vmatmul.mubr.msk.f32.vlgmr.msra.gmra.mxu0 %vm76_vm0, %v891_v7  ;;  %v54_v7 = vld [vmem:[%s3802_s4 + $0x70] sm:$0xff] }
 0x7ad   :  { %2910 = vmatpush3.msra.mxu0 %v67_v35 }
 0x7ae   :  { %2911 = vmatprep.subr.mxu0 %v66_v36 }
 0x7af   :  { %2912 = vmatpush3.msra.mxu0 %v66_v36 }
 0x7b0   :  { %2913 = vmatprep.subr.mxu0 %v65_v37 }
 0x7b1   :  { %2914 = vmatpush3.msra.mxu0 %v65_v37 }
 0x7b2   :  { %2915 = vmatprep.subr.mxu0 %v64_v38 }
 0x7b3   :  { %2916 = vmatpush3.msra.mxu0 %v64_v38 }
 0x7b4   :  { %2917 = vmatprep.subr.mxu0 %v63_v40 }
 0x7b5   :  { %2918 = vmatpush3.msra.mxu0 %v63_v40 }
 0x7b6   :  { %2919 = vmatprep.subr.mxu0 %v62_v41 }
 0x7b7   :  { %2920 = vmatpush3.msra.mxu0 %v62_v41 }
 0x7b8   :  { %2921 = vmatprep.subr.mxu0 %v61_v42 }
 0x7b9   :  { %2922 = vmatpush3.msra.mxu0 %v61_v42  ;;  %v2657_v42 = vld [vmem:[%s3802_s4 + $0xf8] sm:$0xff] }
 0x7ba   :  { %2923 = vmatprep.subr.mxu0 %v60_v43  ;;  %2944 = vmatprep.subr.mxu1 %v2657_v42 }
 0x7bb   :  { %2924 = vmatpush3.msra.mxu0 %v60_v43  ;;  %v2656_v43 = vld [vmem:[%s3802_s4 + $0xf0] sm:$0xff] }
 0x7bc   :  { %2925 = vmatprep.subr.mxu0 %v59_v44 }
 0x7bd   :  { %2926 = vmatpush3.msra.mxu0 %v59_v44  ;;  %v2655_v44 = vld [vmem:[%s3802_s4 + $0xe8] sm:$0xff] }
 0x7be   :  { %2927 = vmatprep.subr.mxu0 %v58_v46 }
 0x7bf   :  { %2928 = vmatpush3.msra.mxu0 %v58_v46  ;;  %v2654_v46 = vld [vmem:[%s3802_s4 + $0xe0] sm:$0xff] }
 0x7c0   :  { %2929 = vmatprep.subr.mxu0 %v57_v47 }
 0x7c1   :  { %2930 = vmatpush3.msra.mxu0 %v57_v47 }
 0x7c2   :  { %2931 = vmatprep.subr.mxu0 %v56_v48 }
 0x7c3   :  { %2932 = vmatpush3.msra.mxu0 %v56_v48 }
 0x7c4   :  { %2933 = vmatprep.subr.mxu0 %v55_v6 }
 0x7c5   :  { %2934 = vmatpush3.msra.mxu0 %v55_v6 }
 0x7c6   :  { %2935 = vmatprep.subr.mxu0 %v54_v7 }
 0x7c7   :  { %2936 = vmatpush3.msra.mxu0 %v54_v7 }
 0x7c8   :  { %2937 = vmatprep.subr.mxu0 %v53_v8 }
 0x7c9   :  { %2938 = vmatpush3.msra.mxu0 %v53_v8 }
 0x86c   :  { %v2897_v10 = vpop.f32.mrf.mxu0 }
 0x86d   :  { %v974_v11 = vadd.f32 %v2897_v10, %v895_v9  ;;  %v74_v10 = vld [vmem:[%s3803_s5 + $0x30] sm:$0xff] }
 0x86e   :  { %v968_v13 = vpop.f32.mrf.mxu0 }
 0x86f   :  { %v978_v14 = vadd.f32 %v974_v11, %v3234_v1  ;;  %v969_v15 = vadd.f32 %v968_v13, %v895_v9  ;;  %v52_v9 = vld [vmem:[%s3802_s4 + $0x60] sm:$0xff]  ;;  %v1022_v11 = vrot.slane %v74_v10, %v3256_v26 }
 0x870   :  { %2939 = vmatprep.subr.mxu0 %v52_v9 }
 0x871   :  { %v3392_v17 = vmul.f32 %v978_v14, %v3383_v12  ;;  %v977_v18 = vadd.f32 %v969_v15, %v3229_v0  ;;  %2940 = vmatpush3.msra.mxu0 %v52_v9 }
 0x872   :  { %2985 = vmatprep.subr.mxu0 %v3170_v39 }
 0x873   :  { %v3396_v19 = vmul.f32 %v977_v18, %v3389_v16  ;;  %v984_v20 = vsel %vm76_vm0, %v3392_v17, 0.0 }
 0x874   :  { %985 = vadd.xlane.f32.xlu1 %v984_v20 }
 0x875   :  { %v981_v1 = vsel %vm76_vm0, %v3396_v19, 0.0 }
 0x876   :  { %982 = vadd.xlane.f32.xlu0 %v981_v1 }
 0x8fd   :  { %v986_v21 = vpop.xlane.xlu1 %985 }
 0x8fe   :  { %v988_v22 = vmul.f32 0.03125, %v986_v21  ;;  %v75_v21 = vld [vmem:[%s3803_s5 + $0x38] sm:$0xff] }
 0x8ff   :  { %v983_v23 = vpop.xlane.xlu0 %982 }
 0x900   :  { %v987_v24 = vmul.f32 0.03125, %v983_v23  ;;  %v3403_v25 = vsub.f32 %v3392_v17, %v988_v22  ;;  %v1109_v22 = vrot.slane %v75_v21, %v3256_v26 }
 0x902   :  { %v3406_v0 = vsub.f32 %v3396_v19, %v987_v24  ;;  %v992_v29 = vmul.f32 %v3403_v25, %v3403_v25 }
 0x904   :  { %v991_v27 = vmul.f32 %v3406_v0, %v3406_v0  ;;  %v996_v30 = vsel %vm76_vm0, %v992_v29, 0.0 }
 0x906   :  { %v993_v28 = vsel %vm76_vm0, %v991_v27, 0.0 }
 0x907   :  { %994 = vadd.xlane.f32.xlu0 %v993_v28 }
 0x90b   :  { %997 = vadd.xlane.f32.xlu0 %v996_v30 }
 0x990   :  { %v995_v49 = vpop.xlane.xlu0 %994 }
 0x991   :  { %v999_v50 = vmul.f32 0.03125, %v995_v49 }
 0x993   :  { %v1001_v51 = vadd.f32 1e-05, %v999_v50 }
 0x994   :  { %v998_v52 = vpop.xlane.xlu0 %997 }
 0x995   :  { %3116 = vrsqrt.f32 %v1001_v51  ;;  %v1000_v45 = vmul.f32 0.03125, %v998_v52 }
 0x997   :  { %v1002_v53 = vadd.f32 1e-05, %v1000_v45  ;;  %v2682_v45 = vld [vmem:[%s3803_s5 + $0x40] sm:$0xff] }
 0x998   :  { %v1256_v55 = vrot.slane %v2682_v45, %v3256_v26 }
 0x999   :  { %3118 = vrsqrt.f32 %v1002_v53 }
 0x9a2   :  { %v3117_v58 = vpop.eup %3116 }
 0x9a3   :  { %v1005_v59 = vmul.f32 %v3117_v58, %v3406_v0 }
 0x9a5   :  { %v1011_v62 = vmul.f32 %v1010_v57, %v1005_v59 }
 0x9a6   :  { %v3119_v63 = vpop.eup %3118 }
 0x9a7   :  { %v1006_v2 = vmul.f32 %v3119_v63, %v3403_v25  ;;  %v1017_v3 = vadd.f32 %v1016_v61, %v1011_v62  ;;  %v1262_v62 = vrot.slane %v2683_v56, %v3256_v26 }
 0x9a9   :  { %v1012_v4 = vmul.f32 %v1010_v57, %v1006_v2  ;;  %2906 = vmatprep.mubr.msk.f32.mxu1 %vm76_vm0, %v1017_v3 }
 0x9ab   :  { %v1018_v5 = vadd.f32 %v1016_v61, %v1012_v4  ;;  %v2684_v4 = vld [vmem:[%s3803_s5 + $0x50] sm:$0xff] }
 0x9ad   :  { %2907 = vmatmul.mubr.msk.f32.vlgmr.msra.gmra.mxu1 %vm76_vm0, %v1018_v5  ;;  %v1268_v5 = vrot.slane %v2684_v4, %v3256_v26 }
 0x9ae   :  { %2945 = vmatpush3.msra.mxu1 %v2657_v42 }
 0x9af   :  { %2946 = vmatprep.subr.mxu1 %v2656_v43 }
 0x9b0   :  { %2947 = vmatpush3.msra.mxu1 %v2656_v43 }
 0x9b1   :  { %2948 = vmatprep.subr.mxu1 %v2655_v44 }
 0x9b2   :  { %2949 = vmatpush3.msra.mxu1 %v2655_v44 }
 0x9b3   :  { %2950 = vmatprep.subr.mxu1 %v2654_v46 }
 0x9b4   :  { %2951 = vmatpush3.msra.mxu1 %v2654_v46 }
 0x9b5   :  { %2955 = vmatprep.subr.mxu1 %v3170_v39 }
 0xa6d   :  { %v2908_v13 = vpop.f32.mrf.mxu1 }
 0xa6e   :  { %v1101_v14 = vadd.f32 %v2908_v13, %v1022_v11 }
 0xa6f   :  { %v1095_v15 = vpop.f32.mrf.mxu1 }
 0xa70   :  { %v1096_v18 = vadd.f32 %v1095_v15, %v1022_v11  ;;  %v1105_v1 = vmax.f32 %v1101_v14, 0.0 }
 0xa72   :  { %v1104_v20 = vmax.f32 %v1096_v18, 0.0 }
 0xa74   :  { %2941 = vmatprep.mubr.f32.mxu0 %v1104_v20 }
 0xa75   :  { %2942 = vmatmul.mubr.f32.vlgmr.msra.gmra.mxu0 %v1105_v1 }
 0xa76   :  { %2987 = vmatprep.mubr.msk.f32.mxu0 %vm3171_vm1, %v3170_v39 }
 0xb35   :  { %v2943_v23 = vpop.f32.mrf.mxu0 }
 0xb36   :  { %v1182_v24 = vadd.f32 %v2943_v23, %v1109_v22 }
 0xb37   :  { %v1176_v25 = vpop.f32.mrf.mxu0 }
 0xb38   :  { %v1186_v0 = vadd.f32 %v1182_v24, %v3392_v17  ;;  %v1177_v27 = vadd.f32 %v1176_v25, %v1109_v22 }
 0xb3a   :  { %v3499_v28 = vmul.f32 %v1186_v0, %v3383_v12  ;;  %v1185_v29 = vadd.f32 %v1177_v27, %v3396_v19 }
 0xb3c   :  { %v3503_v30 = vmul.f32 %v1185_v29, %v3389_v16  ;;  %v1230_v31 = vsel %vm76_vm0, %v3499_v28, 0.0 }
 0xb3d   :  { %1231 = vadd.xlane.f32.xlu1 %v1230_v31 }
 0xb3e   :  { %v1227_v32 = vsel %vm76_vm0, %v3503_v30, 0.0 }
 0xb3f   :  { %1228 = vadd.xlane.f32.xlu0 %v1227_v32 }
 0xbc6   :  { %v1232_v33 = vpop.xlane.xlu1 %1231 }
 0xbc7   :  { %v1234_v34 = vmul.f32 0.03125, %v1232_v33 }
 0xbc8   :  { %v1229_v17 = vpop.xlane.xlu0 %1228 }
 0xbc9   :  { %v1236_v35 = vsub.f32 %v3499_v28, %v1234_v34  ;;  %v1233_v36 = vmul.f32 0.03125, %v1229_v17 }
 0xbcb   :  { %v1235_v37 = vsub.f32 %v3503_v30, %v1233_v36  ;;  %v1238_v19 = vmul.f32 %v1236_v35, %v1236_v35 }
 0xbcd   :  { %v1242_v38 = vsel %vm76_vm0, %v1238_v19, 0.0  ;;  %v1237_v40 = vmul.f32 %v1235_v37, %v1235_v37 }
 0xbce   :  { %1243 = vadd.xlane.f32.xlu1 %v1242_v38 }
 0xbcf   :  { %v1239_v41 = vsel %vm76_vm0, %v1237_v40, 0.0 }
 0xbd0   :  { %1240 = vadd.xlane.f32.xlu0 %v1239_v41 }
 0xc57   :  { %v1244_v47 = vpop.xlane.xlu1 %1243 }
 0xc58   :  { %v1246_v48 = vmul.f32 0.03125, %v1244_v47 }
 0xc59   :  { %v1241_v49 = vpop.xlane.xlu0 %1240 }
 0xc5a   :  { %v1248_v50 = vadd.f32 1e-05, %v1246_v48  ;;  %v1245_v51 = vmul.f32 0.03125, %v1241_v49 }
 0xc5c   :  { %3120 = vrsqrt.f32 %v1248_v50  ;;  %v1247_v52 = vadd.f32 1e-05, %v1245_v51 }
 0xc5e   :  { %3122 = vrsqrt.f32 %v1247_v52 }
 0xc69   :  { %v3121_v53 = vpop.eup %3120 }
 0xc6a   :  { %v1252_v57 = vmul.f32 %v3121_v53, %v1236_v35 }
 0xc6b   :  { %v3123_v58 = vpop.eup %3122 }
 0xc6c   :  { %v1251_v59 = vmul.f32 %v3123_v58, %v1235_v37  ;;  %v1258_v61 = vmul.f32 %v1256_v55, %v1252_v57 }
 0xc6e   :  { %v1257_v63 = vmul.f32 %v1256_v55, %v1251_v59  ;;  %v1264_v3 = vadd.f32 %v1262_v62, %v1258_v61 }
 0xc70   :  { %v1263_v2 = vadd.f32 %v1262_v62, %v1257_v63 }
 0xc72   :  { %2952 = vmatprep.mubr.msk.f32.mxu1 %vm76_vm0, %v1263_v2 }
 0xc73   :  { %2953 = vmatmul.mubr.msk.f32.vlgmr.msra.gmra.mxu1 %vm76_vm0, %v1264_v3 }
 0xc74   :  { %2957 = vmatprep.mubr.msk.f32.mxu1 %vm3171_vm1, %v3170_v39 }
 0xd33   :  { %v2954_v6 = vpop.f32.mrf.mxu1 }
 0xd34   :  { %v3542_v7 = vadd.f32 %v2954_v6, %v1268_v5 }
 0xd35   :  { %v1341_v8 = vpop.f32.mrf.mxu1 }
 0xd36   :  { %v1342_v9 = vadd.f32 %v1341_v8, %v1268_v5  ;;  %v1686_v43 = vmul.f32 0.25, %v3542_v7 }
 0xd38   :  { %1352 = vrot.lane.b32.xlu0 %v1342_v9, %s3172_s22  ;;  %v1350_v11 = vmul.f32 0.25, %v1342_v9 }
 0xd3c   :  { %1518 = vrot.lane.b32.xlu0 %v1342_v9, %s3173_s23 }
 0xdaa   :  { %v1353_v10 = vpop.permute.xlu0 %1352 }
 0xdab   :  { %2956 = vmatpush3.xpose.msk.msra.mxu1 %vm213_vm2, %v1353_v10 }
 0xdac   :  { %2960 = vmatprep.subr.mxu1 %v3170_v39 }
 0xdae   :  { %2958 = vmatmul.mubr.msk.f32.vlgmr.msra.gmra.mxu1 %vm213_vm2, %v1350_v11  ;;  %v1519_v29 = vpop.permute.xlu0 %1518 }
 0xdaf   :  { %2962 = vmatprep.mubr.msk.f32.mxu1 %vm3171_vm1, %v3170_v39 }
 0xe6e   :  { %v1425_v13 = vpop.f32.mrf.mxu1 }
 0xe6f   :  { %v1426_v14 = vadd.f32 %v1425_v13, %v3305_v54 }
 0xe70   :  { %v2959_v15 = vpop.f32.mrf.mxu1 }
 0xe71   :  { %v1429_v18 = vsel %vm289_vm4, %v1426_v14, -inf }
 0xe72   :  { %1430 = vmax.xlane.f32.xlu1 %v1429_v18 }
 0xe83   :  { %1440 = vrot.lane.b32.xlu1 %v1342_v9, %s3175_s29 }
 0xefb   :  { %v1431_v20 = vpop.xlane.xlu1 %1430 }
 0xefc   :  { %v1432_v1 = vsub.f32 %v1426_v14, %v1431_v20 }
 0xefe   :  { %v1433_v21 = vmul.f32 1.442695, %v1432_v1 }
 0xeff   :  { %v1441_v22 = vpop.permute.xlu1 %1440 }
 0xf00   :  { %3124 = vpow2.f32 %v1433_v21  ;;  %2961 = vmatpush3.msra.mxu1 %v1441_v22  ;;  %v2660_v22 = vld [vmem:[%s3802_s4 + $0x110] sm:$0xff] }
 0xf01   :  { %2965 = vmatprep.subr.mxu1 %v3170_v39 }
 0xf0d   :  { %v3125_v23 = vpop.eup %3124 }
 0xf0e   :  { %v1435_v24 = vsel %vm289_vm4, %v3125_v23, 0.0 }
 0xf0f   :  { %1436 = vadd.xlane.f32.xlu1 %v1435_v24 }
 0xf20   :  { %1516 = vrot.lane.b32.xlu1 %v1350_v11, %s3174_s24 }
 0xf24   :  { %1688 = vrot.lane.b32.xlu1 %v3542_v7, %s3172_s22 }
 0xf98   :  { %v1437_v25 = vpop.xlane.xlu1 %1436 }
 0xf99   :  { %3126 = vrcp.f32 %v1437_v25 }
 0xf9c   :  { %v1517_v31 = vpop.permute.xlu1 %1516 }
 0xfa0   :  { %v1689_v44 = vpop.permute.xlu1 %1688 }
 0xfa6   :  { %v3127_v0 = vpop.eup %3126 }
 0xfa7   :  { %v1439_v27 = vmul.f32 %v3127_v0, %v3125_v23  ;;  %v2659_v23 = vld [vmem:[%s3802_s4 + $0x108] sm:$0xff] }
 0xfa9   :  { %2963 = vmatmul.mubr.msk.f32.vlgmr.msra.gmra.mxu1 %vm289_vm4, %v1439_v27 }
 0xfaa   :  { %2966 = vmatpush3.xpose.msk.msra.mxu1 %vm213_vm2, %v1519_v29  ;;  %2967 = vmatprep.mubr.msk.f32.mxu1 %vm3171_vm1, %v3170_v39 }
 0xfab   :  { %2970 = vmatprep.subr.mxu1 %v3170_v39 }
 0xfad   :  { %2968 = vmatmul.mubr.msk.f32.vlgmr.msra.gmra.mxu1 %vm213_vm2, %v1517_v31 }
 0xfae   :  { %2972 = vmatprep.mubr.msk.f32.mxu1 %vm3171_vm1, %v3170_v39 }
0x1069   :  { %v1512_v32 = vpop.f32.mrf.mxu1 }
0x106b   :  { %v2964_v33 = vpop.f32.mrf.mxu1 }
0x106d   :  { %v1590_v34 = vpop.f32.mrf.mxu1 }
0x106e   :  { %v1591_v17 = vadd.f32 %v1590_v34, %v3305_v54 }
0x106f   :  { %v2969_v35 = vpop.f32.mrf.mxu1 }
0x1070   :  { %v1594_v36 = vsel %vm289_vm4, %v1591_v17, -inf }
0x1071   :  { %1595 = vmax.xlane.f32.xlu0 %v1594_v36 }
0x1087   :  { %1605 = vrot.lane.b32.xlu0 %v1342_v9, %s3176_s2 }
0x108b   :  { %1854 = vrot.lane.b32.xlu0 %v3542_v7, %s3173_s23 }
0x10fa   :  { %v1596_v37 = vpop.xlane.xlu0 %1595 }
0x10fb   :  { %v1597_v19 = vsub.f32 %v1591_v17, %v1596_v37 }
0x10fd   :  { %v1598_v38 = vmul.f32 1.442695, %v1597_v19 }
0x10fe   :  { %v1606_v40 = vpop.permute.xlu0 %1605 }
0x10ff   :  { %3128 = vpow2.f32 %v1598_v38  ;;  %2971 = vmatpush3.msra.mxu1 %v1606_v40 }
0x1100   :  { %2975 = vmatprep.subr.mxu1 %v3170_v39 }
0x1102   :  { %v1855_v41 = vpop.permute.xlu0 %1854 }
0x1103   :  { %2986 = vmatpush3.xpose.msk.msra.mxu0 %vm213_vm2, %v1855_v41 }
0x110c   :  { %v3129_v54 = vpop.eup %3128 }
0x110d   :  { %v1600_v42 = vsel %vm289_vm4, %v3129_v54, 0.0 }
0x110e   :  { %1601 = vadd.xlane.f32.xlu1 %v1600_v42 }
0x111f   :  { %1852 = vrot.lane.b32.xlu1 %v1686_v43, %s3174_s24 }
0x1197   :  { %v1602_v46 = vpop.xlane.xlu1 %1601 }
0x1198   :  { %3130 = vrcp.f32 %v1602_v46 }
0x119b   :  { %v1853_v47 = vpop.permute.xlu1 %1852 }
0x119c   :  { %2988 = vmatmul.mubr.msk.f32.vlgmr.msra.gmra.mxu0 %vm213_vm2, %v1853_v47 }
0x11a5   :  { %v3131_v48 = vpop.eup %3130 }
0x11a6   :  { %v1604_v49 = vmul.f32 %v3131_v48, %v3129_v54 }
0x11a8   :  { %2973 = vmatmul.mubr.msk.f32.vlgmr.msra.gmra.mxu1 %vm289_vm4, %v1604_v49 }
0x11a9   :  { %2976 = vmatpush3.xpose.msk.msra.mxu1 %vm213_vm2, %v1689_v44  ;;  %2977 = vmatprep.mubr.msk.f32.mxu1 %vm3171_vm1, %v3170_v39 }
0x11aa   :  { %2980 = vmatprep.subr.mxu1 %v3170_v39 }
0x11ac   :  { %2978 = vmatmul.mubr.msk.f32.vlgmr.msra.gmra.mxu1 %vm213_vm2, %v1686_v43 }
0x11ad   :  { %2982 = vmatprep.mubr.msk.f32.mxu1 %vm3171_vm1, %v3170_v39 }
0x125c   :  { %v1926_v50 = vpop.f32.mrf.mxu0 }
0x125d   :  { %v1927_v51 = vadd.f32 %v1926_v50, %v3312_v60 }
0x125e   :  { %v2989_v52 = vpop.f32.mrf.mxu0 }
0x125f   :  { %v1930_v45 = vsel %vm289_vm4, %v1927_v51, -inf  ;;  %v2664_v52 = vld [vmem:[%s3802_s4 + $0x130] sm:$0xff] }
0x1260   :  { %1931 = vmax.xlane.f32.xlu1 %v1930_v45  ;;  %v2663_v45 = vld [vmem:[%s3802_s4 + $0x128] sm:$0xff] }
0x1268   :  { %v1677_v53 = vpop.f32.mrf.mxu1 }
0x126a   :  { %v2974_v55 = vpop.f32.mrf.mxu1 }
0x126b   :  { %v2681_v55 = vld [vmem:[%s3802_s4 + $0x1b8] sm:$0xff] }
0x126c   :  { %v1761_v56 = vpop.f32.mrf.mxu1 }
0x126d   :  { %v1762_v57 = vadd.f32 %v1761_v56, %v3312_v60  ;;  %v2680_v56 = vld [vmem:[%s3802_s4 + $0x1b0] sm:$0xff] }
0x126e   :  { %v2979_v58 = vpop.f32.mrf.mxu1 }
0x126f   :  { %v1765_v59 = vsel %vm289_vm4, %v1762_v57, -inf  ;;  %v2678_v58 = vld [vmem:[%s3802_s4 + $0x1a0] sm:$0xff] }
0x1270   :  { %1766 = vmax.xlane.f32.xlu0 %v1765_v59  ;;  %v2677_v59 = vld [vmem:[%s3802_s4 + $0x198] sm:$0xff] }
0x1271   :  { %1941 = vrot.lane.b32.xlu1 %v3542_v7, %s3176_s2 }
0x1275   :  { %1682 = vrot.lane.b32.xlu1 %v1677_v53, %s3177_s15  ;;  %v2662_v53 = vld [vmem:[%s3802_s4 + $0x120] sm:$0xff] }
0x12e9   :  { %v1932_v61 = vpop.xlane.xlu1 %1931 }
0x12ea   :  { %v1933_v62 = vsub.f32 %v1927_v51, %v1932_v61  ;;  %v2665_v51 = vld [vmem:[%s3802_s4 + $0x138] sm:$0xff]  ;;  %v2676_v61 = vld [vmem:[%s3802_s4 + $0x190] sm:$0xff] }
0x12ec   :  { %v1934_v63 = vmul.f32 1.442695, %v1933_v62  ;;  %v2675_v62 = vld [vmem:[%s3802_s4 + $0x188] sm:$0xff] }
0x12ed   :  { %v1942_v2 = vpop.permute.xlu1 %1941 }
0x12ee   :  { %3132 = vpow2.f32 %v1934_v63  ;;  %v2674_v63 = vld [vmem:[%s3802_s4 + $0x180] sm:$0xff] }
0x12f1   :  { %v1683_v3 = vpop.permute.xlu1 %1682 }
0x12f2   :  { %v1685_v4 = vsel %vm213_vm2, %v1512_v32, %v1683_v3  ;;  %v2685_v32 = vld [vmem:[%s3803_s5 + $0x58] sm:$0xff]  ;;  %v2672_v3 = vld [vmem:[%s3802_s4 + $0x170] sm:$0xff] }
0x12f3   :  { %3003 = vmatprep.mubr.msk.f32.mxu0 %vm76_vm0, %v1685_v4  ;;  %v2025_v33 = vrot.slane %v2685_v32, %v3256_v26  ;;  %v2671_v4 = vld [vmem:[%s3802_s4 + $0x168] sm:$0xff] }
0x12f9   :  { %v1767_v60 = vpop.xlane.xlu0 %1766 }
0x12fa   :  { %v1768_v5 = vsub.f32 %v1762_v57, %v1767_v60  ;;  %v2679_v57 = vld [vmem:[%s3802_s4 + $0x1a8] sm:$0xff]  ;;  %v2670_v60 = vld [vmem:[%s3802_s4 + $0x160] sm:$0xff] }
0x12fb   :  { %v3133_v6 = vpop.eup %3132 }
0x12fc   :  { %v1769_v8 = vmul.f32 1.442695, %v1768_v5  ;;  %v1936_v9 = vsel %vm289_vm4, %v3133_v6, 0.0 }
0x12fd   :  { %1937 = vadd.xlane.f32.xlu0 %v1936_v9 }
0x12fe   :  { %3134 = vpow2.f32 %v1769_v8 }
0x130b   :  { %v3135_v10 = vpop.eup %3134 }
0x130c   :  { %v1771_v11 = vsel %vm289_vm4, %v3135_v10, 0.0 }
0x130d   :  { %1772 = vadd.xlane.f32.xlu0 %v1771_v11 }
0x1323   :  { %1776 = vrot.lane.b32.xlu0 %v3542_v7, %s3175_s29  ;;  %v2661_v7 = vld [vmem:[%s3802_s4 + $0x118] sm:$0xff] }
0x1324   :  { %2995 = vmatprep.subr.mxu0 %v2661_v7 }
0x1325   :  { %2996 = vmatpush3.msra.mxu0 %v2661_v7 }
0x1326   :  { %2997 = vmatprep.subr.mxu0 %v2660_v22 }
0x1327   :  { %2998 = vmatpush3.msra.mxu0 %v2660_v22 }
0x1328   :  { %2999 = vmatprep.subr.mxu0 %v2659_v23 }
0x1329   :  { %3000 = vmatpush3.msra.mxu0 %v2659_v23 }
0x1386   :  { %v1938_v13 = vpop.xlane.xlu0 %1937 }
0x1396   :  { %v1773_v14 = vpop.xlane.xlu0 %1772 }
0x1397   :  { %3136 = vrcp.f32 %v1773_v14  ;;  %v2687_v14 = vld [vmem:[%s3803_s5 + $0x68] sm:$0xff] }
0x1398   :  { %3138 = vrcp.f32 %v1938_v13  ;;  %v2686_v13 = vld [vmem:[%s3803_s5 + $0x60] sm:$0xff] }
0x139a   :  { %v1777_v15 = vpop.permute.xlu0 %1776 }
0x139b   :  { %2981 = vmatpush3.msra.mxu1 %v1777_v15  ;;  %v2140_v15 = vrot.slane %v2686_v13, %v3256_v26 }
0x139c   :  { %2990 = vmatprep.subr.mxu1 %v3170_v39 }
0x13a4   :  { %v3137_v18 = vpop.eup %3136 }
0x13a5   :  { %v1775_v20 = vmul.f32 %v3137_v18, %v3135_v10  ;;  %v3139_v1 = vpop.eup %3138 }
0x13a6   :  { %v1940_v21 = vmul.f32 %v3139_v1, %v3133_v6  ;;  %v2146_v1 = vrot.slane %v2687_v14, %v3256_v26 }
0x13a7   :  { %2983 = vmatmul.mubr.msk.f32.vlgmr.msra.gmra.mxu1 %vm289_vm4, %v1775_v20 }
0x13a8   :  { %2991 = vmatpush3.msra.mxu1 %v1942_v2  ;;  %2992 = vmatprep.mubr.msk.f32.mxu1 %vm3171_vm1, %v3170_v39  ;;  %v2658_v39 = vld [vmem:[%s3802_s4 + $0x100] sm:$0xff]  ;;  %v2673_v2 = vld [vmem:[%s3802_s4 + $0x178] sm:$0xff] }
0x13a9   :  { %3001 = vmatprep.subr.mxu0 %v2658_v39  ;;  %3006 = vmatprep.subr.mxu1 %v2665_v51 }
0x13aa   :  { %3002 = vmatpush3.msra.mxu0 %v2658_v39 }
0x13ab   :  { %2993 = vmatmul.mubr.msk.f32.vlgmr.msra.gmra.mxu1 %vm289_vm4, %v1940_v21  ;;  %3017 = vmatprep.subr.mxu0 %v2681_v55 }
0x13ac   :  { %3007 = vmatpush3.msra.mxu1 %v2665_v51 }
0x13ad   :  { %3008 = vmatprep.subr.mxu1 %v2664_v52 }
0x13ae   :  { %3009 = vmatpush3.msra.mxu1 %v2664_v52 }
0x13af   :  { %3010 = vmatprep.subr.mxu1 %v2663_v45 }
0x13b0   :  { %3011 = vmatpush3.msra.mxu1 %v2663_v45 }
0x13b1   :  { %3012 = vmatprep.subr.mxu1 %v2662_v53 }
0x13b2   :  { %3013 = vmatpush3.msra.mxu1 %v2662_v53 }
0x1467   :  { %v1848_v24 = vpop.f32.mrf.mxu1 }
0x1469   :  { %v2984_v25 = vpop.f32.mrf.mxu1 }
0x146a   :  { %v2669_v25 = vld [vmem:[%s3802_s4 + $0x158] sm:$0xff] }
0x146b   :  { %v2013_v0 = vpop.f32.mrf.mxu1 }
0x146c   :  { %2018 = vrot.lane.b32.xlu1 %v2013_v0, %s3177_s15  ;;  %v2668_v0 = vld [vmem:[%s3802_s4 + $0x150] sm:$0xff] }
0x146d   :  { %v2994_v27 = vpop.f32.mrf.mxu1 }
0x146e   :  { %v2667_v27 = vld [vmem:[%s3802_s4 + $0x148] sm:$0xff] }
0x14de   :  { %v2019_v29 = vpop.permute.xlu1 %2018 }
0x14df   :  { %v2021_v31 = vsel %vm213_vm2, %v1848_v24, %v2019_v29  ;;  %v2666_v29 = vld [vmem:[%s3802_s4 + $0x140] sm:$0xff] }
0x14e0   :  { %3004 = vmatmul.mubr.msk.f32.vlgmr.msra.gmra.mxu0 %vm76_vm0, %v2021_v31  ;;  %v2688_v31 = vld [vmem:[%s3803_s5 + $0x70] sm:$0xff] }
0x14e1   :  { %3018 = vmatpush3.msra.mxu0 %v2681_v55  ;;  %v2152_v32 = vrot.slane %v2688_v31, %v3256_v26 }
0x14e2   :  { %3019 = vmatprep.subr.mxu0 %v2680_v56 }
0x14e3   :  { %3020 = vmatpush3.msra.mxu0 %v2680_v56 }
0x14e4   :  { %3021 = vmatprep.subr.mxu0 %v2679_v57 }
0x14e5   :  { %3022 = vmatpush3.msra.mxu0 %v2679_v57 }
0x14e6   :  { %3023 = vmatprep.subr.mxu0 %v2678_v58 }
0x14e7   :  { %3024 = vmatpush3.msra.mxu0 %v2678_v58 }
0x14e8   :  { %3025 = vmatprep.subr.mxu0 %v2677_v59 }
0x14e9   :  { %3026 = vmatpush3.msra.mxu0 %v2677_v59 }
0x14ea   :  { %3027 = vmatprep.subr.mxu0 %v2676_v61 }
0x14eb   :  { %3028 = vmatpush3.msra.mxu0 %v2676_v61 }
0x14ec   :  { %3029 = vmatprep.subr.mxu0 %v2675_v62 }
0x14ed   :  { %3030 = vmatpush3.msra.mxu0 %v2675_v62 }
0x14ee   :  { %3031 = vmatprep.subr.mxu0 %v2674_v63 }
0x14ef   :  { %3032 = vmatpush3.msra.mxu0 %v2674_v63 }
0x14f0   :  { %3033 = vmatprep.subr.mxu0 %v2673_v2 }
0x14f1   :  { %3034 = vmatpush3.msra.mxu0 %v2673_v2 }
0x14f2   :  { %3035 = vmatprep.subr.mxu0 %v2672_v3 }
0x14f3   :  { %3036 = vmatpush3.msra.mxu0 %v2672_v3 }
0x14f4   :  { %3037 = vmatprep.subr.mxu0 %v2671_v4 }
0x14f5   :  { %3038 = vmatpush3.msra.mxu0 %v2671_v4 }
0x14f6   :  { %3039 = vmatprep.subr.mxu0 %v2670_v60 }
0x14f7   :  { %3040 = vmatpush3.msra.mxu0 %v2670_v60 }
0x14f8   :  { %3041 = vmatprep.subr.mxu0 %v2669_v25 }
0x14f9   :  { %3042 = vmatpush3.msra.mxu0 %v2669_v25 }
0x14fa   :  { %3043 = vmatprep.subr.mxu0 %v2668_v0 }
0x14fb   :  { %3044 = vmatpush3.msra.mxu0 %v2668_v0 }
0x14fc   :  { %3045 = vmatprep.subr.mxu0 %v2667_v27 }
0x14fd   :  { %3046 = vmatpush3.msra.mxu0 %v2667_v27 }
0x14fe   :  { %3047 = vmatprep.subr.mxu0 %v2666_v29 }
0x14ff   :  { %3048 = vmatpush3.msra.mxu0 %v2666_v29 }
0x15a0   :  { %v3005_v34 = vpop.f32.mrf.mxu0 }
0x15a1   :  { %v2104_v17 = vadd.f32 %v3005_v34, %v2025_v33 }
0x15a2   :  { %v2098_v35 = vpop.f32.mrf.mxu0 }
0x15a3   :  { %v2108_v36 = vadd.f32 %v2104_v17, %v3499_v28  ;;  %v2099_v37 = vadd.f32 %v2098_v35, %v2025_v33 }
0x15a5   :  { %v3625_v19 = vmul.f32 %v2108_v36, %v3383_v12  ;;  %v2107_v38 = vadd.f32 %v2099_v37, %v3503_v30 }
0x15a7   :  { %v3629_v40 = vmul.f32 %v2107_v38, %v3389_v16  ;;  %v2114_v41 = vsel %vm76_vm0, %v3625_v19, 0.0  ;;  %v2322_v38 = vld [vmem:[%s3804_s6 + $0x18] sm:$0xff] }
0x15a8   :  { %2115 = vadd.xlane.f32.xlu1 %v2114_v41  ;;  %v2321_v41 = vld [vmem:[%s3804_s6 + $0x10] sm:$0xff]  ;;  %3052 = vmatprep.subr.mxu1 %v2322_v38 }
0x15a9   :  { %v2111_v54 = vsel %vm76_vm0, %v3629_v40, 0.0 }
0x15aa   :  { %2112 = vadd.xlane.f32.xlu0 %v2111_v54  ;;  %v2334_v54 = vld [vmem:[%s3801_s3] sm:$0xff] }
0x1631   :  { %v2116_v42 = vpop.xlane.xlu1 %2115 }
0x1632   :  { %v2118_v43 = vmul.f32 0.03125, %v2116_v42  ;;  %v2320_v42 = vld [vmem:[%s3804_s6 + $0x8] sm:$0xff] }
0x1633   :  { %v2113_v28 = vpop.xlane.xlu0 %2112 }
0x1634   :  { %v2117_v44 = vmul.f32 0.03125, %v2113_v28  ;;  %v3636_v46 = vsub.f32 %v3625_v19, %v2118_v43  ;;  %v2319_v43 = vld [vmem:[%s3804_s6] sm:$0xff]  ;;  %v2326_v28 = vld [vmem:[%s3804_s6 + $0x38] sm:$0xff] }
0x1636   :  { %v3639_v30 = vsub.f32 %v3629_v40, %v2117_v44  ;;  %v2122_v49 = vmul.f32 %v3636_v46, %v3636_v46  ;;  %v2335_v44 = vld [vmem:[%s3801_s3 + $0x8] sm:$0xff] }
0x1638   :  { %v2121_v47 = vmul.f32 %v3639_v30, %v3639_v30  ;;  %v2126_v50 = vsel %vm76_vm0, %v2122_v49, 0.0 }
0x163a   :  { %v2123_v48 = vsel %vm76_vm0, %v2121_v47, 0.0  ;;  %v2323_v47 = vld [vmem:[%s3804_s6 + $0x20] sm:$0xff] }
0x163b   :  { %2124 = vadd.xlane.f32.xlu0 %v2123_v48  ;;  %v2689_v48 = vld [vmem:[%s3803_s5 + $0x78] sm:$0xff] }
0x163c   :  { %v2239_v49 = vrot.slane %v2689_v48, %v3256_v26 }
0x163f   :  { %2127 = vadd.xlane.f32.xlu0 %v2126_v50 }
0x16c4   :  { %v2125_v5 = vpop.xlane.xlu0 %2124 }
0x16c5   :  { %v2129_v6 = vmul.f32 0.03125, %v2125_v5  ;;  %v2329_v5 = vld [vmem:[%s3804_s6 + $0x50] sm:$0xff] }
0x16c7   :  { %v2131_v8 = vadd.f32 1e-05, %v2129_v6  ;;  %v2328_v6 = vld [vmem:[%s3804_s6 + $0x48] sm:$0xff] }
0x16c8   :  { %v2128_v9 = vpop.xlane.xlu0 %2127 }
0x16c9   :  { %3140 = vrsqrt.f32 %v2131_v8  ;;  %v2130_v10 = vmul.f32 0.03125, %v2128_v9  ;;  %v2327_v8 = vld [vmem:[%s3804_s6 + $0x40] sm:$0xff] }
0x16cb   :  { %v2132_v11 = vadd.f32 1e-05, %v2130_v10 }
0x16cd   :  { %3142 = vrsqrt.f32 %v2132_v11 }
0x16d6   :  { %v3141_v18 = vpop.eup %3140 }
0x16d7   :  { %v2135_v20 = vmul.f32 %v3141_v18, %v3639_v30  ;;  %v2324_v30 = vld [vmem:[%s3804_s6 + $0x28] sm:$0xff] }
0x16d9   :  { %v2141_v21 = vmul.f32 %v2140_v15, %v2135_v20  ;;  %v2331_v20 = vld [vmem:[%s3805_s7] sm:$0xff] }
0x16da   :  { %v3143_v7 = vpop.eup %3142 }
0x16db   :  { %v2136_v22 = vmul.f32 %v3143_v7, %v3636_v46  ;;  %v2147_v23 = vadd.f32 %v2146_v1, %v2141_v21  ;;  %v2325_v46 = vld [vmem:[%s3804_s6 + $0x30] sm:$0xff]  ;;  %v2332_v21 = vld [vmem:[%s3805_s7 + $0x8] sm:$0xff]  ;;  %v2365_v7 = vrot.slane %v2331_v20, %v3256_v26 }
0x16dd   :  { %v2142_v39 = vmul.f32 %v2140_v15, %v2136_v22  ;;  %3014 = vmatprep.mubr.msk.f32.mxu1 %vm76_vm0, %v2147_v23 }
0x16df   :  { %v2148_v24 = vadd.f32 %v2146_v1, %v2142_v39  ;;  %v2450_v39 = vrot.slane %v2332_v21, %v3256_v26 }
0x16e1   :  { %3015 = vmatmul.mubr.msk.f32.vlgmr.msra.gmra.mxu1 %vm76_vm0, %v2148_v24 }
0x16e2   :  { %3053 = vmatpush3.msra.mxu1 %v2322_v38  ;;  %3060 = vmatprep.mubr.msk.f32.mxu1 %vm76_vm0, %v2334_v54 }
0x16e3   :  { %3054 = vmatprep.subr.mxu1 %v2321_v41 }
0x16e4   :  { %3055 = vmatpush3.msra.mxu1 %v2321_v41 }
0x16e5   :  { %3056 = vmatprep.subr.mxu1 %v2320_v42 }
0x16e6   :  { %3057 = vmatpush3.msra.mxu1 %v2320_v42 }
0x16e7   :  { %3058 = vmatprep.subr.mxu1 %v2319_v43 }
0x16e8   :  { %3059 = vmatpush3.msra.mxu1 %v2319_v43 }
0x16e9   :  { %3063 = vmatprep.subr.mxu1 %v2326_v28  ;;  %3061 = vmatmul.mubr.msk.f32.vlgmr.msra.gmra.mxu1 %vm76_vm0, %v2335_v44 }
0x16ea   :  { %3064 = vmatpush3.msra.mxu1 %v2326_v28  ;;  %3071 = vmatprep.mubr.msk.f32.mxu1 %vm76_vm0, %v2334_v54 }
0x16eb   :  { %3065 = vmatprep.subr.mxu1 %v2325_v46 }
0x16ec   :  { %3066 = vmatpush3.msra.mxu1 %v2325_v46 }
0x16ed   :  { %3067 = vmatprep.subr.mxu1 %v2324_v30 }
0x16ee   :  { %3068 = vmatpush3.msra.mxu1 %v2324_v30 }
0x16ef   :  { %3069 = vmatprep.subr.mxu1 %v2323_v47 }
0x16f0   :  { %3070 = vmatpush3.msra.mxu1 %v2323_v47 }
0x16f1   :  { %3072 = vmatmul.mubr.msk.f32.vlgmr.msra.gmra.mxu1 %vm76_vm0, %v2335_v44 }
0x17a1   :  { %v3016_v33 = vpop.f32.mrf.mxu1 }
0x17a2   :  { %v2231_v34 = vadd.f32 %v3016_v33, %v2152_v32 }
0x17a3   :  { %v2225_v17 = vpop.f32.mrf.mxu1 }
0x17a4   :  { %v2226_v35 = vadd.f32 %v2225_v17, %v2152_v32  ;;  %v2235_v37 = vmax.f32 %v2231_v34, 0.0 }
0x17a6   :  { %v2234_v36 = vmax.f32 %v2226_v35, 0.0 }
0x17a8   :  { %3049 = vmatprep.mubr.f32.mxu0 %v2234_v36 }
0x17a9   :  { %3050 = vmatmul.mubr.f32.vlgmr.msra.gmra.mxu0 %v2235_v37  ;;  %v3062_v18 = vpop.f32.mrf.mxu1  ;;  %v2333_v37 = vld [vmem:[%s3805_s7 + $0x10] sm:$0xff] }
0x17aa   :  { %v2444_v0 = vadd.f32 %v3062_v18, %v2365_v7  ;;  %v2533_v38 = vrot.slane %v2333_v37, %v3256_v26 }
0x17ab   :  { %v2438_v1 = vpop.f32.mrf.mxu1 }
0x17ac   :  { %v2439_v31 = vadd.f32 %v2438_v1, %v2365_v7 }
0x17b1   :  { %v3073_v22 = vpop.f32.mrf.mxu1 }
0x17b2   :  { %v2523_v33 = vadd.f32 %v3073_v22, %v2450_v39 }
0x17b3   :  { %v2517_v27 = vpop.f32.mrf.mxu1 }
0x17b4   :  { %v2518_v17 = vadd.f32 %v2517_v27, %v2450_v39 }
0x1869   :  { %v3051_v50 = vpop.f32.mrf.mxu0 }
0x186a   :  { %v2312_v51 = vadd.f32 %v3051_v50, %v2239_v49 }
0x186b   :  { %v2306_v52 = vpop.f32.mrf.mxu0 }
0x186c   :  { %v2316_v45 = vadd.f32 %v2312_v51, %v3625_v19  ;;  %v2307_v53 = vadd.f32 %v2306_v52, %v2239_v49 }
0x186e   :  { %v2315_v55 = vadd.f32 %v2307_v53, %v3629_v40  ;;  %v2318_v56 = vmul.f32 %v2316_v45, %v3383_v12 }
0x1870   :  { %v2339_v57 = vsel %vm76_vm0, %v2318_v56, 0.0  ;;  %v2317_v58 = vmul.f32 %v2315_v55, %v3389_v16  ;;  %v2330_v16 = vld [vmem:[%s3804_s6 + $0x58] sm:$0xff] }
0x1871   :  { %2340 = vadd.xlane.f32.xlu1 %v2339_v57  ;;  %3074 = vmatprep.subr.mxu1 %v2330_v16 }
0x1872   :  { %v2336_v59 = vsel %vm76_vm0, %v2317_v58, 0.0  ;;  %3075 = vmatpush3.msra.mxu1 %v2330_v16 }
0x1873   :  { %2337 = vadd.xlane.f32.xlu0 %v2336_v59  ;;  %3076 = vmatprep.subr.mxu1 %v2329_v5 }
0x1874   :  { %3077 = vmatpush3.msra.mxu1 %v2329_v5 }
0x1875   :  { %3078 = vmatprep.subr.mxu1 %v2328_v6 }
0x1876   :  { %3079 = vmatpush3.msra.mxu1 %v2328_v6 }
0x1877   :  { %3080 = vmatprep.subr.mxu1 %v2327_v8 }
0x1878   :  { %3081 = vmatpush3.msra.mxu1 %v2327_v8 }
0x18fa   :  { %v2341_v61 = vpop.xlane.xlu1 %2340 }
0x18fb   :  { %v2343_v62 = vmul.f32 0.03125, %v2341_v61 }
0x18fc   :  { %v2338_v63 = vpop.xlane.xlu0 %2337 }
0x18fd   :  { %v2345_v2 = vsub.f32 %v2318_v56, %v2343_v62  ;;  %v2342_v3 = vmul.f32 0.03125, %v2338_v63 }
0x18ff   :  { %v2344_v4 = vsub.f32 %v2317_v58, %v2342_v3  ;;  %v2347_v19 = vmul.f32 %v2345_v2, %v2345_v2 }
0x1901   :  { %v2351_v60 = vsel %vm76_vm0, %v2347_v19, 0.0  ;;  %v2346_v40 = vmul.f32 %v2344_v4, %v2344_v4 }
0x1902   :  { %2352 = vadd.xlane.f32.xlu1 %v2351_v60 }
0x1903   :  { %v2348_v12 = vsel %vm76_vm0, %v2346_v40, 0.0 }
0x1904   :  { %2349 = vadd.xlane.f32.xlu0 %v2348_v12 }
0x198b   :  { %v2353_v9 = vpop.xlane.xlu1 %2352 }
0x198c   :  { %v2355_v10 = vmul.f32 0.03125, %v2353_v9 }
0x198d   :  { %v2350_v11 = vpop.xlane.xlu0 %2349 }
0x198e   :  { %v2357_v13 = vadd.f32 1e-05, %v2355_v10  ;;  %v2354_v14 = vmul.f32 0.03125, %v2350_v11 }
0x1990   :  { %3144 = vrsqrt.f32 %v2357_v13  ;;  %v2356_v15 = vadd.f32 1e-05, %v2354_v14 }
0x1992   :  { %3146 = vrsqrt.f32 %v2356_v15 }
0x199d   :  { %v3145_v23 = vpop.eup %3144 }
0x199e   :  { %v2361_v24 = vmul.f32 %v3145_v23, %v2345_v2 }
0x199f   :  { %v3147_v25 = vpop.eup %3146 }
0x19a0   :  { %v2360_v29 = vmul.f32 %v3147_v25, %v2344_v4  ;;  %v2527_v32 = vmul.f32 %v2444_v0, %v2361_v24 }
0x19a2   :  { %v2526_v34 = vmul.f32 %v2439_v31, %v2360_v29  ;;  %v2529_v36 = vadd.f32 %v2527_v32, %v2523_v33 }
0x19a4   :  { %v2528_v35 = vadd.f32 %v2526_v34, %v2518_v17 }
0x19a6   :  { %3082 = vmatprep.mubr.msk.f32.mxu1 %vm76_vm0, %v2528_v35 }
0x19a7   :  { %3083 = vmatmul.mubr.msk.f32.vlgmr.msra.gmra.mxu1 %vm76_vm0, %v2529_v36 }
0x1a67   :  { %v3084_v41 = vpop.f32.mrf.mxu1 }
0x1a68   :  { %v2612_v54 = vadd.f32 %v3084_v41, %v2533_v38 }
0x1a69   :  { %v2606_v42 = vpop.f32.mrf.mxu1 }
0x1a6a   :  { %2616 = vst [vmem:[#allocation2 + $0x8] sm:$0xff] %v2612_v54  ;;  %v2607_v43 = vadd.f32 %v2606_v42, %v2533_v38 }
0x1a6c   :  { %2615 = vst [vmem:[#allocation2] sm:$0xff] %v2607_v43 }
0x1a6d   :  { %3159 = shalt.err (!%p3156_p4)
}
0x1a6e   :  { %s3179_s17 = smov 128   ;;  %s3180_s7 = smov 8  }
0x1a6f   :  { %2628 = dma.vmem_to_hbm [thread:$0]  %s2623_s14, 256, %s3806_s8, [#allocation3], %s3179_s17, %s3179_s17, %s3180_s7  }
0x1a70   :  { %3168 = dma.done.wait [#allocation3], 256  }
0x1a71   :  { %3169 = vsyncadd [#allocation3], 4294967040 }
0x1a72   :  { %2632 = vsyncpa [#allocation3], 1 }

</bundles_post_ra>
